<compile_context>
chip_gen: v7x
topology: tpu7x:2x2x1
jax: 0.10.0
libtpu: 0.0.40
codegen_flags: <defaults>
</compile_context>

<pallas_src>
from functools import partial

import jax
import jax.numpy as jnp
from jax.experimental import pallas as pl
from jax.experimental.pallas import tpu as pltpu


def _round_up(n, m):
    return ((n + m - 1) // m) * m


def _num_tensorcores_per_chip():
    try:
        kind = jax.devices()[0].device_kind.lower()
    except Exception:
        return 1
    return 2 if ("v7" in kind or "7x" in kind) else 1


def _pick_block_b(B, S):
    """One grid step per TensorCore by default; cap per-step slab for very large B."""
    num_cores = _num_tensorcores_per_chip()
    tb = _round_up(pl.cdiv(_round_up(B, 8), num_cores), 8)
    # Cap at ~2048 flattened rows per step (keeps x/h1/h2/t VMEM bounded, restores DMA
    # pipelining for big batches) while each step still feeds the MXU >= 256 rows.
    cap = max(8, _round_up(pl.cdiv(2048, max(S, 1)), 8))
    return min(tb, cap)


def _vanjari_kernel(sc_ref,              # SMEM (3,) f32 : [prelu_a1, prelu_a2, attn_bias2]
                    x_ref,               # VMEM (TB*S, D_in)  compute dtype (unpadded lanes)
                    w1_ref, b1_ref,      # (D_in, F1p) cdt, (1, F1p) f32
                    w2_ref, b2_ref,      # (F1p, F2p) cdt, (1, F2p) f32
                    wa1_ref, ba1_ref,    # (F2p, Hp) cdt, (1, Hp) f32
                    wa2_ref,             # (1, Hp) f32  (second attention Linear, transposed)
                    wc_ref, bc_ref,      # (F2p, Cp) cdt, (1, Cp) f32
                    out_ref,             # VMEM (TB, Cp) f32
                    *, seq_len):
    rows = x_ref.shape[0]
    TB = rows // seq_len
    a1 = sc_ref[0]
    a2 = sc_ref[1]
    ba2 = sc_ref[2]
    cdt = w1_ref.dtype

    # sequential: Linear + PReLU, Linear + PReLU (+ Dropout(p=0) == identity)
    x = x_ref[...]                                                     # (TB*S, D_in)
    h1 = jnp.dot(x, w1_ref[...], preferred_element_type=jnp.float32) + b1_ref[...]
    h1 = jnp.where(h1 >= 0.0, h1, a1 * h1)

    h2 = jnp.dot(h1.astype(cdt), w2_ref[...],
                 preferred_element_type=jnp.float32) + b2_ref[...]
    h2 = jnp.where(h2 >= 0.0, h2, a2 * h2)                             # (TB*S, F2p) f32

    # attention: Linear -> tanh -> (Linear(H,1) as VPU multiply + lane reduce, no N=1 MXU)
    t = jnp.tanh(jnp.dot(h2.astype(cdt), wa1_ref[...],
                         preferred_element_type=jnp.float32) + ba1_ref[...])  # (TB*S, Hp)
    Hp = wa1_ref.shape[1]
    scores = jnp.sum(t.reshape(TB, seq_len, Hp) * wa2_ref[...].reshape(1, 1, Hp),
                     axis=-1) + ba2                                    # (TB, S)

    # softmax over the sequence dimension (per batch row); reciprocal on the EUP slot
    m = jnp.max(scores, axis=-1, keepdims=True)
    e = jnp.exp(scores - m)
    denom = jnp.sum(e, axis=-1, keepdims=True)
    attn = e * pl.reciprocal(denom, approx=True)                       # (TB, S)

    # context vector: attention-weighted sum over the sequence
    F2p = w2_ref.shape[1]
    context = jnp.sum(attn[:, :, None] * h2.reshape(TB, seq_len, F2p), axis=1)  # (TB, F2p)

    # classifier (hierarchical-softmax logits == plain linear at forward time)
    logits = jnp.dot(context.astype(cdt), wc_ref[...],
                     preferred_element_type=jnp.float32) + bc_ref[...]          # (TB, Cp)
    out_ref[...] = logits


def prepare_params(params, *, compute_dtype=jnp.float32):
    """One-time padding/casting of weights (hoisted out of the per-call forward path).

    Feature (N) dims are zero-padded to 128 lanes; D_in (the x contraction dim) is left
    unpadded.  Zero padding is inert: padded bias columns are 0, PReLU(0)=0, tanh(0)=0
    meets zero-padded wa2 rows, padded wc rows/columns contribute nothing, and padded
    logit columns are sliced off.  Biases stay float32 (added after f32 accumulation).
    Returns (prepared_dict, num_classes).
    """
    LANE = 128
    D_in, F1 = params["w1"].shape
    F2 = params["w2"].shape[1]
    H = params["wa1"].shape[1]
    C = params["wc"].shape[1]
    F1p, F2p, Hp, Cp = (_round_up(v, LANE) for v in (F1, F2, H, C))

    def pad2(w, r, c, dtype):
        return jnp.pad(w, ((0, r - w.shape[0]), (0, c - w.shape[1]))).astype(dtype)

    prepared = {
        # PReLU slopes + attention output bias packed into SMEM scalars
        "scalars": jnp.concatenate([params["prelu"].reshape(-1),
                                    params["ba2"].reshape(-1)]).astype(jnp.float32),
        "w1": pad2(params["w1"], D_in, F1p, compute_dtype),
        "b1": pad2(params["b1"], 1, F1p, jnp.float32),
        "w2": pad2(params["w2"], F1p, F2p, compute_dtype),
        "b2": pad2(params["b2"], 1, F2p, jnp.float32),
        "wa1": pad2(params["wa1"], F2p, Hp, compute_dtype),
        "ba1": pad2(params["ba1"], 1, Hp, jnp.float32),
        "wa2": pad2(params["wa2"].T, 1, Hp, jnp.float32),   # (1, Hp); VPU operand, keep f32
        "wc": pad2(params["wc"], F2p, Cp, compute_dtype),
        "bc": pad2(params["bc"], 1, Cp, jnp.float32),
    }
    return prepared, C


def vanjari_attention_forward(x, prepared, *, num_classes, block_b=None):
    """x: (B, S, D_in) float; prepared: output of prepare_params().  Returns (B, C) f32."""
    B, S, D_in = x.shape
    cdt = prepared["w1"].dtype
    Cp = prepared["wc"].shape[1]

    if block_b is None:
        block_b = _pick_block_b(B, S)
    TB = max(8, (block_b // 8) * 8)
    Bp = _round_up(B, TB)

    # mirror `x.to(dtype=self.model_dtype)`; batch padding only if TB doesn't divide B
    xc = x.astype(cdt)
    if Bp != B:
        xc = jnp.pad(xc, ((0, Bp - B), (0, 0), (0, 0)))   # padded rows -> finite, sliced off
    x2 = xc.reshape(Bp * S, D_in)                         # free row-major reshape

    rows = TB * S
    full = lambda arr: pl.BlockSpec(arr.shape, lambda i: (0,) * arr.ndim)

    grid_spec = pltpu.PrefetchScalarGridSpec(
        num_scalar_prefetch=0,
        grid=(Bp // TB,),
        in_specs=[
            pl.BlockSpec(memory_space=pltpu.MemorySpace.SMEM),   # packed scalars
            pl.BlockSpec((rows, D_in), lambda i: (i, 0)),        # x: unpadded lanes
            full(prepared["w1"]), full(prepared["b1"]),
            full(prepared["w2"]), full(prepared["b2"]),
            full(prepared["wa1"]), full(prepared["ba1"]), full(prepared["wa2"]),
            full(prepared["wc"]), full(prepared["bc"]),
        ],
        out_specs=pl.BlockSpec((TB, Cp), lambda i: (i, 0)),      # lane/sublane-dense output
    )

    out = pl.pallas_call(
        partial(_vanjari_kernel, seq_len=S),
        out_shape=jax.ShapeDtypeStruct((Bp, Cp), jnp.float32),
        grid_spec=grid_spec,
        compiler_params=pltpu.CompilerParams(dimension_semantics=("parallel",)),
    )(prepared["scalars"], x2,
      prepared["w1"], prepared["b1"], prepared["w2"], prepared["b2"],
      prepared["wa1"], prepared["ba1"], prepared["wa2"],
      prepared["wc"], prepared["bc"])

    return out[:B, :num_classes]


def reference_forward(x, params):
    """Pure-JAX reference matching the PyTorch forward semantics (float32)."""
    x = x.astype(jnp.float32)
    a1 = params["prelu"][0, 0]
    a2 = params["prelu"][0, 1]
    h1 = x @ params["w1"] + params["b1"]
    h1 = jnp.where(h1 >= 0.0, h1, a1 * h1)
    h2 = h1 @ params["w2"] + params["b2"]
    h2 = jnp.where(h2 >= 0.0, h2, a2 * h2)
    scores = jnp.tanh(h2 @ params["wa1"] + params["ba1"]) @ params["wa2"] + params["ba2"]
    attn = jax.nn.softmax(scores, axis=1)                 # softmax over the sequence dim
    context = jnp.sum(attn * h2, axis=1)                  # (B, F2)
    return context @ params["wc"] + params["bc"]


def init_params(key, d_in, f1, f2, h, c):
    ks = jax.random.split(key, 10)
    n = lambda k, shape, s=0.1: (s * jax.random.normal(k, shape)).astype(jnp.float32)
    return {
        # two nn.PReLU() modules -> two slopes (distinct values so mix-ups are caught)
        "prelu": jnp.array([[0.25, 0.10]], dtype=jnp.float32),
        "w1": n(ks[0], (d_in, f1)), "b1": n(ks[1], (1, f1)),
        "w2": n(ks[2], (f1, f2)),   "b2": n(ks[3], (1, f2)),
        "wa1": n(ks[4], (f2, h)),   "ba1": n(ks[5], (1, h)),
        "wa2": n(ks[6], (h, 1)),    "ba2": n(ks[7], (1, 1)),
        "wc": n(ks[8], (f2, c)),    "bc": n(ks[9], (1, c)),
    }


if __name__ == "__main__":
    B, S, D_IN = 32, 8, 16        # batch, sequence length, input embedding size
    F1, F2 = 16, 32               # features, features * growth_factor
    H, C = 16, 8                  # attention_hidden_size, hierarchical-softmax layer size

    key = jax.random.PRNGKey(0)
    k_x, k_p = jax.random.split(key)
    x = jax.random.normal(k_x, (B, S, D_IN), dtype=jnp.float32)
    params = init_params(k_p, D_IN, F1, F2, H, C)

    ref = reference_forward(x, params)

    # f32 operand path: parity check (only approx-reciprocal softmax deviates, ~2^-12 rel).
    prepared_f32, num_classes = prepare_params(params, compute_dtype=jnp.float32)
    fwd_f32 = jax.jit(lambda xx: vanjari_attention_forward(
        xx, prepared_f32, num_classes=num_classes))
    out = jax.block_until_ready(fwd_f32(x))
    assert out.shape == (B, C)
    assert jnp.allclose(out, ref, atol=2e-3, rtol=2e-3), (out, ref)

    # bf16 operand path (v6e/v7x MXU peak, halved weight/x DMA); f32 accumulation throughout.
    prepared_bf16, _ = prepare_params(params, compute_dtype=jnp.bfloat16)
    fwd_bf16 = jax.jit(lambda xx: vanjari_attention_forward(
        xx, prepared_bf16, num_classes=num_classes))
    out_bf16 = jax.block_until_ready(fwd_bf16(x))
    assert out_bf16.shape == (B, C)
    assert jnp.allclose(out_bf16, ref, atol=1e-1, rtol=1e-1), (out_bf16, ref)

    print("KERNEL_OK")
</pallas_src>

<mosaic_0001>
module attributes {stable_mosaic.version = 11 : i64} {
  func.func @_vanjari_kernel(%arg0: i32, %arg1: memref<3xf32, #tpu.memory_space<smem>>, %arg2: memref<256x16xf32, #tpu.memory_space<vmem>>, %arg3: memref<16x128xf32, #tpu.memory_space<vmem>>, %arg4: memref<1x128xf32, #tpu.memory_space<vmem>>, %arg5: memref<128x128xf32, #tpu.memory_space<vmem>>, %arg6: memref<1x128xf32, #tpu.memory_space<vmem>>, %arg7: memref<128x128xf32, #tpu.memory_space<vmem>>, %arg8: memref<1x128xf32, #tpu.memory_space<vmem>>, %arg9: memref<1x128xf32, #tpu.memory_space<vmem>>, %arg10: memref<128x128xf32, #tpu.memory_space<vmem>>, %arg11: memref<1x128xf32, #tpu.memory_space<vmem>>, %arg12: memref<32x128xf32, #tpu.memory_space<vmem>>) attributes {dimension_semantics = [#tpu.dimension_semantics<parallel>], iteration_bounds = array<i64: 1>, scalar_prefetch = 0 : i64, scratch_operands = 0 : i64, tpu.core_type = #tpu.core_type<tc>, window_params = [{transform_indices = @transform_0, window_bounds = array<i64: 3>}, {transform_indices = @transform_1, window_bounds = array<i64: 256, 16>}, {pipeline_mode = #tpu.pipeline_mode<synchronous>, transform_indices = @transform_2, window_bounds = array<i64: 16, 128>}, {pipeline_mode = #tpu.pipeline_mode<synchronous>, transform_indices = @transform_3, window_bounds = array<i64: 1, 128>}, {pipeline_mode = #tpu.pipeline_mode<synchronous>, transform_indices = @transform_4, window_bounds = array<i64: 128, 128>}, {pipeline_mode = #tpu.pipeline_mode<synchronous>, transform_indices = @transform_5, window_bounds = array<i64: 1, 128>}, {pipeline_mode = #tpu.pipeline_mode<synchronous>, transform_indices = @transform_6, window_bounds = array<i64: 128, 128>}, {pipeline_mode = #tpu.pipeline_mode<synchronous>, transform_indices = @transform_7, window_bounds = array<i64: 1, 128>}, {pipeline_mode = #tpu.pipeline_mode<synchronous>, transform_indices = @transform_8, window_bounds = array<i64: 1, 128>}, {pipeline_mode = #tpu.pipeline_mode<synchronous>, transform_indices = @transform_9, window_bounds = array<i64: 128, 128>}, {pipeline_mode = #tpu.pipeline_mode<synchronous>, transform_indices = @transform_10, window_bounds = array<i64: 1, 128>}, {transform_indices = @transform_11, window_bounds = array<i64: 32, 128>}]} {
    %c0 = arith.constant 0 : index
    %0 = memref.load %arg1[%c0] : memref<3xf32, #tpu.memory_space<smem>>
    %c1 = arith.constant 1 : index
    %1 = memref.load %arg1[%c1] : memref<3xf32, #tpu.memory_space<smem>>
    %c2 = arith.constant 2 : index
    %2 = memref.load %arg1[%c2] : memref<3xf32, #tpu.memory_space<smem>>
    %c0_0 = arith.constant 0 : index
    %c0_1 = arith.constant 0 : index
    %3 = vector.load %arg2[%c0_0, %c0_1] : memref<256x16xf32, #tpu.memory_space<vmem>>, vector<256x16xf32>
    %c0_2 = arith.constant 0 : index
    %c0_3 = arith.constant 0 : index
    %4 = vector.load %arg3[%c0_2, %c0_3] : memref<16x128xf32, #tpu.memory_space<vmem>>, vector<16x128xf32>
    %cst = arith.constant dense<0.000000e+00> : vector<256x128xf32>
    %5 = tpu.matmul %3, %4, %cst {dimension_numbers = #tpu.dot_dimension_numbers<[1], [0], [0], [1], [0, 0, 1, 1], [], []>} : vector<256x16xf32>, vector<16x128xf32>, vector<256x128xf32> -> vector<256x128xf32>
    %c0_4 = arith.constant 0 : index
    %c0_5 = arith.constant 0 : index
    %6 = vector.load %arg4[%c0_4, %c0_5] : memref<1x128xf32, #tpu.memory_space<vmem>>, vector<1x128xf32>
    %7 = vector.broadcast %6 : vector<1x128xf32> to vector<256x128xf32>
    %8 = arith.addf %5, %7 : vector<256x128xf32>
    %cst_6 = arith.constant 0.000000e+00 : f32
    %9 = vector.broadcast %cst_6 : f32 to vector<256x128xf32>
    %10 = arith.cmpf oge, %8, %9 : vector<256x128xf32>
    %11 = vector.broadcast %0 : f32 to vector<256x128xf32>
    %12 = arith.mulf %11, %8 : vector<256x128xf32>
    %13 = arith.select %10, %8, %12 : vector<256x128xi1>, vector<256x128xf32>
    %c0_7 = arith.constant 0 : index
    %c0_8 = arith.constant 0 : index
    %14 = vector.load %arg5[%c0_7, %c0_8] : memref<128x128xf32, #tpu.memory_space<vmem>>, vector<128x128xf32>
    %cst_9 = arith.constant dense<0.000000e+00> : vector<256x128xf32>
    %15 = tpu.matmul %13, %14, %cst_9 {dimension_numbers = #tpu.dot_dimension_numbers<[1], [0], [0], [1], [0, 0, 1, 1], [], []>} : vector<256x128xf32>, vector<128x128xf32>, vector<256x128xf32> -> vector<256x128xf32>
    %c0_10 = arith.constant 0 : index
    %c0_11 = arith.constant 0 : index
    %16 = vector.load %arg6[%c0_10, %c0_11] : memref<1x128xf32, #tpu.memory_space<vmem>>, vector<1x128xf32>
    %17 = vector.broadcast %16 : vector<1x128xf32> to vector<256x128xf32>
    %18 = arith.addf %15, %17 : vector<256x128xf32>
    %cst_12 = arith.constant 0.000000e+00 : f32
    %19 = vector.broadcast %cst_12 : f32 to vector<256x128xf32>
    %20 = arith.cmpf oge, %18, %19 : vector<256x128xf32>
    %21 = vector.broadcast %1 : f32 to vector<256x128xf32>
    %22 = arith.mulf %21, %18 : vector<256x128xf32>
    %23 = arith.select %20, %18, %22 : vector<256x128xi1>, vector<256x128xf32>
    %c0_13 = arith.constant 0 : index
    %c0_14 = arith.constant 0 : index
    %24 = vector.load %arg7[%c0_13, %c0_14] : memref<128x128xf32, #tpu.memory_space<vmem>>, vector<128x128xf32>
    %cst_15 = arith.constant dense<0.000000e+00> : vector<256x128xf32>
    %25 = tpu.matmul %23, %24, %cst_15 {dimension_numbers = #tpu.dot_dimension_numbers<[1], [0], [0], [1], [0, 0, 1, 1], [], []>} : vector<256x128xf32>, vector<128x128xf32>, vector<256x128xf32> -> vector<256x128xf32>
    %c0_16 = arith.constant 0 : index
    %c0_17 = arith.constant 0 : index
    %26 = vector.load %arg8[%c0_16, %c0_17] : memref<1x128xf32, #tpu.memory_space<vmem>>, vector<1x128xf32>
    %27 = vector.broadcast %26 : vector<1x128xf32> to vector<256x128xf32>
    %28 = arith.addf %25, %27 : vector<256x128xf32>
    %29 = math.tanh %28 : vector<256x128xf32>
    %30 = vector.shape_cast %29 : vector<256x128xf32> to vector<32x8x128xf32>
    %c0_18 = arith.constant 0 : index
    %c0_19 = arith.constant 0 : index
    %31 = vector.load %arg9[%c0_18, %c0_19] : memref<1x128xf32, #tpu.memory_space<vmem>>, vector<1x128xf32>
    %32 = vector.shape_cast %31 : vector<1x128xf32> to vector<1x1x128xf32>
    %33 = vector.broadcast %32 : vector<1x1x128xf32> to vector<32x8x128xf32>
    %34 = arith.mulf %30, %33 : vector<32x8x128xf32>
    %cst_20 = arith.constant dense<0.000000e+00> : vector<32x8xf32>
    %35 = vector.multi_reduction <add>, %34, %cst_20 [2] : vector<32x8x128xf32> to vector<32x8xf32>
    %36 = vector.broadcast %2 : f32 to vector<32x8xf32>
    %37 = arith.addf %35, %36 : vector<32x8xf32>
    %cst_21 = arith.constant dense<0xFF800000> : vector<32xf32>
    %38 = vector.multi_reduction <maximumf>, %37, %cst_21 [1] : vector<32x8xf32> to vector<32xf32>
    %39 = vector.shape_cast %38 : vector<32xf32> to vector<32x1xf32>
    %40 = vector.broadcast %39 : vector<32x1xf32> to vector<32x8xf32>
    %41 = arith.subf %37, %40 : vector<32x8xf32>
    %42 = math.exp %41 : vector<32x8xf32>
    %cst_22 = arith.constant dense<0.000000e+00> : vector<32xf32>
    %43 = vector.multi_reduction <add>, %42, %cst_22 [1] : vector<32x8xf32> to vector<32xf32>
    %44 = vector.shape_cast %43 : vector<32xf32> to vector<32x1xf32>
    %45 = tpu.reciprocal %44 {approx = true} : vector<32x1xf32> -> vector<32x1xf32>
    %46 = vector.broadcast %45 : vector<32x1xf32> to vector<32x8xf32>
    %47 = arith.mulf %42, %46 : vector<32x8xf32>
    %48 = vector.shape_cast %47 : vector<32x8xf32> to vector<32x8x1xf32>
    %49 = vector.shape_cast %23 : vector<256x128xf32> to vector<32x8x128xf32>
    %50 = vector.broadcast %48 : vector<32x8x1xf32> to vector<32x8x128xf32>
    %51 = arith.mulf %50, %49 : vector<32x8x128xf32>
    %cst_23 = arith.constant dense<0.000000e+00> : vector<32x128xf32>
    %52 = vector.multi_reduction <add>, %51, %cst_23 [1] : vector<32x8x128xf32> to vector<32x128xf32>
    %c0_24 = arith.constant 0 : index
    %c0_25 = arith.constant 0 : index
    %53 = vector.load %arg10[%c0_24, %c0_25] : memref<128x128xf32, #tpu.memory_space<vmem>>, vector<128x128xf32>
    %cst_26 = arith.constant dense<0.000000e+00> : vector<32x128xf32>
    %54 = tpu.matmul %52, %53, %cst_26 {dimension_numbers = #tpu.dot_dimension_numbers<[1], [0], [0], [1], [0, 0, 1, 1], [], []>} : vector<32x128xf32>, vector<128x128xf32>, vector<32x128xf32> -> vector<32x128xf32>
    %c0_27 = arith.constant 0 : index
    %c0_28 = arith.constant 0 : index
    %55 = vector.load %arg11[%c0_27, %c0_28] : memref<1x128xf32, #tpu.memory_space<vmem>>, vector<1x128xf32>
    %56 = vector.broadcast %55 : vector<1x128xf32> to vector<32x128xf32>
    %57 = arith.addf %54, %56 : vector<32x128xf32>
    %c0_29 = arith.constant 0 : index
    %c0_30 = arith.constant 0 : index
    %58 = vector.load %arg12[%c0_29, %c0_30] : memref<32x128xf32, #tpu.memory_space<vmem>>, vector<32x128xf32>
    tpu.vector_store %arg12[%c0_29, %c0_30], %57 {strides = array<i32>} : memref<32x128xf32, #tpu.memory_space<vmem>>, vector<32x128xf32>,
    return
  }
  func.func @transform_0(%arg0: i32) -> i32 {
    %c0_i32 = arith.constant 0 : i32
    %c0_i32_0 = arith.constant 0 : i32
    return %c0_i32 : i32
  }
  func.func @transform_1(%arg0: i32) -> (i32, i32) {
    %c0_i32 = arith.constant 0 : i32
    %c0_i32_0 = arith.constant 0 : i32
    return %arg0, %c0_i32 : i32, i32
  }
  func.func @transform_2(%arg0: i32) -> (i32, i32) {
    %c0_i32 = arith.constant 0 : i32
    %c0_i32_0 = arith.constant 0 : i32
    %c0_i32_1 = arith.constant 0 : i32
    return %c0_i32, %c0_i32_0 : i32, i32
  }
  func.func @transform_3(%arg0: i32) -> (i32, i32) {
    %c0_i32 = arith.constant 0 : i32
    %c0_i32_0 = arith.constant 0 : i32
    %c0_i32_1 = arith.constant 0 : i32
    return %c0_i32, %c0_i32_0 : i32, i32
  }
  func.func @transform_4(%arg0: i32) -> (i32, i32) {
    %c0_i32 = arith.constant 0 : i32
    %c0_i32_0 = arith.constant 0 : i32
    %c0_i32_1 = arith.constant 0 : i32
    return %c0_i32, %c0_i32_0 : i32, i32
  }
  func.func @transform_5(%arg0: i32) -> (i32, i32) {
    %c0_i32 = arith.constant 0 : i32
    %c0_i32_0 = arith.constant 0 : i32
    %c0_i32_1 = arith.constant 0 : i32
    return %c0_i32, %c0_i32_0 : i32, i32
  }
  func.func @transform_6(%arg0: i32) -> (i32, i32) {
    %c0_i32 = arith.constant 0 : i32
    %c0_i32_0 = arith.constant 0 : i32
    %c0_i32_1 = arith.constant 0 : i32
    return %c0_i32, %c0_i32_0 : i32, i32
  }
  func.func @transform_7(%arg0: i32) -> (i32, i32) {
    %c0_i32 = arith.constant 0 : i32
    %c0_i32_0 = arith.constant 0 : i32
    %c0_i32_1 = arith.constant 0 : i32
    return %c0_i32, %c0_i32_0 : i32, i32
  }
  func.func @transform_8(%arg0: i32) -> (i32, i32) {
    %c0_i32 = arith.constant 0 : i32
    %c0_i32_0 = arith.constant 0 : i32
    %c0_i32_1 = arith.constant 0 : i32
    return %c0_i32, %c0_i32_0 : i32, i32
  }
  func.func @transform_9(%arg0: i32) -> (i32, i32) {
    %c0_i32 = arith.constant 0 : i32
    %c0_i32_0 = arith.constant 0 : i32
    %c0_i32_1 = arith.constant 0 : i32
    return %c0_i32, %c0_i32_0 : i32, i32
  }
  func.func @transform_10(%arg0: i32) -> (i32, i32) {
    %c0_i32 = arith.constant 0 : i32
    %c0_i32_0 = arith.constant 0 : i32
    %c0_i32_1 = arith.constant 0 : i32
    return %c0_i32, %c0_i32_0 : i32, i32
  }
  func.func @transform_11(%arg0: i32) -> (i32, i32) {
    %c0_i32 = arith.constant 0 : i32
    %c0_i32_0 = arith.constant 0 : i32
    return %arg0, %c0_i32 : i32, i32
  }
}

</mosaic_0001>

<bundles_post_ra>
// kernel: _lambda_.1
= control target key start
LH: loop header
LB: loop body
LE: loop exit
PB: predicated region body
PF: predicated region fallthrough
CT: control target
= control target key end

     0   :  { %16 = vsyncpa [#allocation4], 0  ;;  %s4923_s0 = inlined_call_operand.hbm [shape: f32[3], index: 0, kind: input, shape index: {}]   ;;  %s4924_s1 = inlined_call_operand.vmem [shape: f32[256,16], index: 1, kind: input, shape index: {}]   ;;  %s4925_s2 = inlined_call_operand.hbm [shape: f32[16,128], index: 2, kind: input, shape index: {}]   ;;  %s4926_s3 = inlined_call_operand.vmem [shape: f32[1,128], index: 3, kind: input, shape index: {}]   ;;  %s4927_s4 = inlined_call_operand.vmem [shape: f32[128,128], index: 4, kind: input, shape index: {}]   ;;  %s4928_s5 = inlined_call_operand.vmem [shape: f32[1,128], index: 5, kind: input, shape index: {}]   ;;  %s4929_s6 = inlined_call_operand.vmem [shape: f32[128,128], index: 6, kind: input, shape index: {}]   ;;  %s4930_s7 = inlined_call_operand.vmem [shape: f32[1,128], index: 7, kind: input, shape index: {}]   ;;  %s4931_s8 = inlined_call_operand.vmem [shape: f32[1,128], index: 8, kind: input, shape index: {}]   ;;  %s4932_s9 = inlined_call_operand.vmem [shape: f32[128,128], index: 9, kind: input, shape index: {}]   ;;  %s4933_s10 = inlined_call_operand.vmem [shape: f32[1,128], index: 10, kind: input, shape index: {}]   ;;  %s4934_s11 = inlined_call_operand.vmem [shape: f32[32,128], index: 11, kind: output, shape index: {}]  }
   0x1   :  { %17 = vsyncpa [#allocation3], 0  ;;  %s3527_s19 = scalar_lea.hbm %s4923_s0, 16 }
   0x2   :  { %p3528_p0 = scmp.ne.s32.totalorder %s4923_s0, %s3527_s19  ;;  %p3531_p1 = scmp.lt.u32.totalorder %s3527_s19, %s4923_s0 }
   0x4   :  { %p3533_p2 = pnand %p3531_p1, %p3528_p0 }
   0x6   :  { %3536 = shalt.err (!%p3533_p2)
}
   0x7   :  { %s3563_s24 = smov [#allocation2]   ;;  %s3564_s27 = smov [#allocation5]  }
   0x8   :  { %25 = dma.hbm_to_smem %s4923_s0, 16, %s3563_s24, [#allocation4]  }
   0x9   :  { %s33_s28 = sshll.u32 %s3564_s27, 4  ;;  %s3537_s12 = scalar_lea.hbm %s4925_s2, 256  ;;  %s34_s28 = int_to_ptr.vmem [resolvable:$true] %s33_s28 }
   0xa   :  { %p3538_p3 = scmp.ne.s32.totalorder %s4925_s2, %s3537_s12  ;;  %p3541_p4 = scmp.lt.u32.totalorder %s3537_s12, %s4925_s2 }
   0xc   :  { %p3543_p5 = pnand %p3541_p4, %p3538_p3 }
   0xe   :  { %3546 = shalt.err (!%p3543_p5)
}
   0xf   :  { %s3547_s17 = scalar_lea.vmem %s34_s28, 256  ;;  %p3552_p7 = scmp.lt.s32.totalorder %s34_s28, %s34_s28 }
  0x10   :  { %p3548_p6 = scmp.ne.s32.totalorder %s34_s28, %s3547_s17  ;;  %p3553_p8 = scmp.lt.s32.totalorder %s3547_s17, %s3547_s17 }
  0x12   :  { %p3554_p9 = por %p3553_p8, %p3552_p7 }
  0x14   :  { %p3555_p10 = pnand %p3554_p9, %p3548_p6 }
  0x16   :  { %3558 = shalt.err (!%p3555_p10)
}
  0x17   :  { %s3565_s0 = smov 128   ;;  %s3566_s18 = smov 8  }
  0x18   :  { %39 = dma.hbm_to_vmem [thread:$0]  %s4925_s2, 256, %s34_s28, [#allocation3], %s3565_s0, %s3565_s0, %s3566_s18  }
  0x19   :  { %3559 = dma.done.wait [#allocation4], 16  }
  0x1a   :  { %3560 = vsyncadd [#allocation4], 4294967280 }
  0x1b   :  { %3561 = dma.done.wait [#allocation3], 256  }
  0x1c   :  { %3562 = vsyncadd [#allocation3], 4294967040 }
  0x1d   :  { %62 = sfence }
  0x1e   :  { %v98_v0 = vld [vmem:[#allocation5] sm:$0xff]  ;;  %v99_v1 = vld [vmem:[#allocation5 + $0x8] sm:$0xff]  ;;  %vm107_vm0 = vcmask 130048   ;;  %v68_v5 = vld [vmem:[%s4924_s1 + $0x10] sm:$0xff]  ;;  %s63_s17 = sld [smem:[#allocation2]]  ;;  %s2827_s21 = sld [smem:[#allocation2 + $0x1]] }
  0x1f   :  { %v66_v2 = vld [vmem:[%s4924_s1] sm:$0xff]  ;;  %v3266_v3 = vpack.c.bf16 %v99_v1, %v98_v0  ;;  %v67_v4 = vld [vmem:[%s4924_s1 + $0x8] sm:$0xff]  ;;  %v84_v8 = vld [vmem:[%s4924_s1 + $0x90] sm:$0xff] }
  0x20   :  { %3020 = vmatprep.mubr.msk.f32.mxu0 %vm107_vm0, %v66_v2  ;;  %v82_v6 = vld [vmem:[%s4924_s1 + $0x80] sm:$0xff]  ;;  %v83_v7 = vld [vmem:[%s4924_s1 + $0x88] sm:$0xff]  ;;  %v69_v9 = vld [vmem:[%s4924_s1 + $0x18] sm:$0xff] }
  0x21   :  { %3267 = vmatprep.subr.bf16.mxu0 %v3266_v3  ;;  %3366 = vmatprep.subr.bf16.mxu1 %v3266_v3  ;;  %v70_v10 = vld [vmem:[%s4924_s1 + $0x20] sm:$0xff]  ;;  %v85_v11 = vld [vmem:[%s4924_s1 + $0x98] sm:$0xff]  ;;  %v527_v14 = vld [vmem:[%s4927_s4 + $0x8] sm:$0xff] }
  0x22   :  { %3269 = vmatpush3.bf16.msra.mxu0 %v3266_v3  ;;  %3367 = vmatpush3.bf16.msra.mxu1 %v3266_v3  ;;  %v86_v12 = vld [vmem:[%s4924_s1 + $0xa0] sm:$0xff]  ;;  %v71_v15 = vld [vmem:[%s4924_s1 + $0x28] sm:$0xff]  ;;  %v528_v17 = vld [vmem:[%s4927_s4 + $0x10] sm:$0xff] }
  0x23   :  { %3044 = vmatprep.mubr.msk.f32.mxu1 %vm107_vm0, %v82_v6  ;;  %v526_v13 = vld [vmem:[%s4927_s4] sm:$0xff]  ;;  %v529_v18 = vld [vmem:[%s4927_s4 + $0x18] sm:$0xff]  ;;  %v72_v19 = vld [vmem:[%s4924_s1 + $0x30] sm:$0xff] }
  0x24   :  { %v3270_v16 = vpack.c.bf16 %v527_v14, %v526_v13  ;;  %v87_v20 = vld [vmem:[%s4924_s1 + $0xa8] sm:$0xff]  ;;  %v3274_v21 = vpack.c.bf16 %v529_v18, %v528_v17  ;;  %v88_v22 = vld [vmem:[%s4924_s1 + $0xb0] sm:$0xff]  ;;  %v530_v23 = vld [vmem:[%s4927_s4 + $0x20] sm:$0xff]  ;;  %v3875_v18 = vstv %s63_s17 }
  0x25   :  { %3021 = vmatmul.mubr.msk.f32.vlgmr.msra.gmra.mrb[0].mxu0 %vm107_vm0, %v67_v4  ;;  %3045 = vmatmul.mubr.msk.f32.vlgmr.msra.gmra.mrb[0].mxu1 %vm107_vm0, %v83_v7  ;;  %v531_v24 = vld [vmem:[%s4927_s4 + $0x28] sm:$0xff]  ;;  %v73_v25 = vld [vmem:[%s4924_s1 + $0x38] sm:$0xff]  ;;  %v74_v26 = vld [vmem:[%s4924_s1 + $0x40] sm:$0xff] }
  0x26   :  { %3023 = vmatprep.mubr.msk.f32.mxu0 %vm107_vm0, %v68_v5  ;;  %3047 = vmatprep.mubr.msk.f32.mxu1 %vm107_vm0, %v84_v8  ;;  %v89_v27 = vld [vmem:[%s4924_s1 + $0xb8] sm:$0xff]  ;;  %v3278_v28 = vpack.c.bf16 %v531_v24, %v530_v23  ;;  %v90_v29 = vld [vmem:[%s4924_s1 + $0xc0] sm:$0xff]  ;;  %v532_v30 = vld [vmem:[%s4927_s4 + $0x30] sm:$0xff] }
  0x27   :  { %3271 = vmatprep.subr.bf16.mxu1 %v3270_v16  ;;  %v533_v31 = vld [vmem:[%s4927_s4 + $0x38] sm:$0xff]  ;;  %v75_v32 = vld [vmem:[%s4924_s1 + $0x48] sm:$0xff]  ;;  %v76_v33 = vld [vmem:[%s4924_s1 + $0x50] sm:$0xff] }
  0x28   :  { %3273 = vmatpush3.bf16.msra.mxu1 %v3270_v16  ;;  %v91_v34 = vld [vmem:[%s4924_s1 + $0xc8] sm:$0xff]  ;;  %v3282_v35 = vpack.c.bf16 %v533_v31, %v532_v30  ;;  %v92_v36 = vld [vmem:[%s4924_s1 + $0xd0] sm:$0xff]  ;;  %v534_v37 = vld [vmem:[%s4927_s4 + $0x40] sm:$0xff] }
  0x29   :  { %3024 = vmatmul.mubr.msk.f32.gmra.mrb[2].mxu0 %vm107_vm0, %v69_v9  ;;  %3048 = vmatmul.mubr.msk.f32.gmra.mrb[2].mxu1 %vm107_vm0, %v85_v11  ;;  %v535_v38 = vld [vmem:[%s4927_s4 + $0x48] sm:$0xff]  ;;  %v77_v39 = vld [vmem:[%s4924_s1 + $0x58] sm:$0xff]  ;;  %v78_v40 = vld [vmem:[%s4924_s1 + $0x60] sm:$0xff] }
  0x2a   :  { %3026 = vmatprep.mubr.msk.f32.mxu0 %vm107_vm0, %v70_v10  ;;  %3050 = vmatprep.mubr.msk.f32.mxu1 %vm107_vm0, %v86_v12  ;;  %v93_v41 = vld [vmem:[%s4924_s1 + $0xd8] sm:$0xff]  ;;  %v3286_v42 = vpack.c.bf16 %v535_v38, %v534_v37  ;;  %v94_v43 = vld [vmem:[%s4924_s1 + $0xe0] sm:$0xff]  ;;  %v536_v44 = vld [vmem:[%s4927_s4 + $0x50] sm:$0xff] }
  0x2b   :  { %3275 = vmatprep.subr.bf16.mxu1 %v3274_v21  ;;  %v537_v45 = vld [vmem:[%s4927_s4 + $0x58] sm:$0xff]  ;;  %v79_v46 = vld [vmem:[%s4924_s1 + $0x68] sm:$0xff]  ;;  %v80_v47 = vld [vmem:[%s4924_s1 + $0x70] sm:$0xff] }
  0x2c   :  { %3277 = vmatpush3.bf16.msra.mxu1 %v3274_v21  ;;  %v95_v48 = vld [vmem:[%s4924_s1 + $0xe8] sm:$0xff]  ;;  %v3290_v49 = vpack.c.bf16 %v537_v45, %v536_v44  ;;  %v538_v50 = vld [vmem:[%s4927_s4 + $0x60] sm:$0xff]  ;;  %v96_v52 = vld [vmem:[%s4924_s1 + $0xf0] sm:$0xff] }
  0x2d   :  { %3027 = vmatmul.mubr.msk.f32.gmra.mrb[4].mxu0 %vm107_vm0, %v71_v15  ;;  %3051 = vmatmul.mubr.msk.f32.gmra.mrb[4].mxu1 %vm107_vm0, %v87_v20  ;;  %v539_v51 = vld [vmem:[%s4927_s4 + $0x68] sm:$0xff]  ;;  %v81_v53 = vld [vmem:[%s4924_s1 + $0x78] sm:$0xff]  ;;  %v540_v56 = vld [vmem:[%s4927_s4 + $0x70] sm:$0xff] }
  0x2e   :  { %3029 = vmatprep.mubr.msk.f32.mxu0 %vm107_vm0, %v72_v19  ;;  %3053 = vmatprep.mubr.msk.f32.mxu1 %vm107_vm0, %v88_v22  ;;  %v3294_v54 = vpack.c.bf16 %v539_v51, %v538_v50  ;;  %v97_v55 = vld [vmem:[%s4924_s1 + $0xf8] sm:$0xff]  ;;  %v871_v59 = vld [vmem:[%s4929_s6] sm:$0xff]  ;;  %v872_v60 = vld [vmem:[%s4929_s6 + $0x8] sm:$0xff] }
  0x2f   :  { %3279 = vmatprep.subr.bf16.mxu1 %v3278_v28  ;;  %v541_v57 = vld [vmem:[%s4927_s4 + $0x78] sm:$0xff]  ;;  %v873_v61 = vld [vmem:[%s4929_s6 + $0x10] sm:$0xff]  ;;  %v3302_v62 = vpack.c.bf16 %v872_v60, %v871_v59  ;;  %v875_v1 = vld [vmem:[%s4929_s6 + $0x20] sm:$0xff] }
  0x30   :  { %3281 = vmatpush3.bf16.msra.mxu1 %v3278_v28  ;;  %v3298_v58 = vpack.c.bf16 %v541_v57, %v540_v56  ;;  %v874_v63 = vld [vmem:[%s4929_s6 + $0x18] sm:$0xff]  ;;  %v876_v2 = vld [vmem:[%s4929_s6 + $0x28] sm:$0xff]  ;;  %v877_v4 = vld [vmem:[%s4929_s6 + $0x30] sm:$0xff] }
  0x31   :  { %3030 = vmatmul.mubr.msk.f32.gmra.mrb[6].mxu0 %vm107_vm0, %v73_v25  ;;  %3054 = vmatmul.mubr.msk.f32.gmra.mrb[6].mxu1 %vm107_vm0, %v89_v27  ;;  %v3306_v0 = vpack.c.bf16 %v874_v63, %v873_v61  ;;  %v3310_v3 = vpack.c.bf16 %v876_v2, %v875_v1  ;;  %v878_v5 = vld [vmem:[%s4929_s6 + $0x38] sm:$0xff]  ;;  %v879_v7 = vld [vmem:[%s4929_s6 + $0x40] sm:$0xff]  ;;  %v880_v8 = vld [vmem:[%s4929_s6 + $0x48] sm:$0xff] }
  0x32   :  { %3032 = vmatprep.mubr.msk.f32.mxu0 %vm107_vm0, %v74_v26  ;;  %3056 = vmatprep.mubr.msk.f32.mxu1 %vm107_vm0, %v90_v29  ;;  %v3314_v6 = vpack.c.bf16 %v878_v5, %v877_v4  ;;  %v3318_v9 = vpack.c.bf16 %v880_v8, %v879_v7  ;;  %v881_v10 = vld [vmem:[%s4929_s6 + $0x50] sm:$0xff]  ;;  %v882_v11 = vld [vmem:[%s4929_s6 + $0x58] sm:$0xff]  ;;  %v883_v13 = vld [vmem:[%s4929_s6 + $0x60] sm:$0xff] }
  0x33   :  { %3283 = vmatprep.subr.bf16.mxu1 %v3282_v35  ;;  %3303 = vmatprep.subr.bf16.mxu0 %v3302_v62  ;;  %v3322_v12 = vpack.c.bf16 %v882_v11, %v881_v10  ;;  %v884_v14 = vld [vmem:[%s4929_s6 + $0x68] sm:$0xff]  ;;  %v3873_v16 = vld [vmem:[%s4926_s3] ss:$0 sm:$0xff] }
  0x34   :  { %3285 = vmatpush3.bf16.msra.mxu1 %v3282_v35  ;;  %3305 = vmatpush3.bf16.msra.mxu0 %v3302_v62  ;;  %v3326_v15 = vpack.c.bf16 %v884_v14, %v883_v13 }
  0x35   :  { %3033 = vmatmul.mubr.msk.f32.gmra.mrb[8].mxu0 %vm107_vm0, %v75_v32  ;;  %3057 = vmatmul.mubr.msk.f32.gmra.mrb[8].mxu1 %vm107_vm0, %v91_v34 }
  0x36   :  { %3035 = vmatprep.mubr.msk.f32.mxu0 %vm107_vm0, %v76_v33  ;;  %3059 = vmatprep.mubr.msk.f32.mxu1 %vm107_vm0, %v92_v36 }
  0x37   :  { %3287 = vmatprep.subr.bf16.mxu1 %v3286_v42  ;;  %3307 = vmatprep.subr.bf16.mxu0 %v3306_v0 }
  0x38   :  { %3289 = vmatpush3.bf16.msra.mxu1 %v3286_v42  ;;  %3309 = vmatpush3.bf16.msra.mxu0 %v3306_v0 }
  0x39   :  { %3036 = vmatmul.mubr.msk.f32.gmra.mrb[10].mxu0 %vm107_vm0, %v77_v39  ;;  %3060 = vmatmul.mubr.msk.f32.gmra.mrb[10].mxu1 %vm107_vm0, %v93_v41 }
  0x3a   :  { %3038 = vmatprep.mubr.msk.f32.mxu0 %vm107_vm0, %v78_v40  ;;  %3062 = vmatprep.mubr.msk.f32.mxu1 %vm107_vm0, %v94_v43 }
  0x3b   :  { %3291 = vmatprep.subr.bf16.mxu1 %v3290_v49  ;;  %3311 = vmatprep.subr.bf16.mxu0 %v3310_v3 }
  0x3c   :  { %3293 = vmatpush3.bf16.msra.mxu1 %v3290_v49  ;;  %3313 = vmatpush3.bf16.msra.mxu0 %v3310_v3 }
  0x3d   :  { %3039 = vmatmul.mubr.msk.f32.gmra.mrb[12].mxu0 %vm107_vm0, %v79_v46  ;;  %3063 = vmatmul.mubr.msk.f32.gmra.mrb[12].mxu1 %vm107_vm0, %v95_v48 }
  0x3e   :  { %3041 = vmatprep.mubr.msk.f32.mxu0 %vm107_vm0, %v80_v47  ;;  %3065 = vmatprep.mubr.msk.f32.mxu1 %vm107_vm0, %v96_v52 }
  0x3f   :  { %3295 = vmatprep.subr.bf16.mxu1 %v3294_v54  ;;  %3315 = vmatprep.subr.bf16.mxu0 %v3314_v6 }
  0x40   :  { %3297 = vmatpush3.bf16.msra.mxu1 %v3294_v54  ;;  %3317 = vmatpush3.bf16.msra.mxu0 %v3314_v6 }
  0x41   :  { %3042 = vmatmul.mubr.msk.f32.gmra.mrb[14].mxu0 %vm107_vm0, %v81_v53  ;;  %3066 = vmatmul.mubr.msk.f32.gmra.mrb[14].mxu1 %vm107_vm0, %v97_v55 }
  0x42   :  { %3299 = vmatprep.subr.bf16.mxu1 %v3298_v58  ;;  %3319 = vmatprep.subr.bf16.mxu0 %v3318_v9 }
  0x44   :  { %3301 = vmatpush3.bf16.msra.mxu1 %v3298_v58  ;;  %3321 = vmatpush3.bf16.msra.mxu0 %v3318_v9 }
  0x45   :  { %3323 = vmatprep.subr.bf16.mxu0 %v3322_v12 }
  0x48   :  { %3325 = vmatpush3.bf16.msra.mxu0 %v3322_v12 }
  0x49   :  { %3327 = vmatprep.subr.bf16.mxu0 %v3326_v15 }
  0x4c   :  { %3329 = vmatpush3.bf16.msra.mxu0 %v3326_v15 }
  0xf8   :  { %v3022_v17 = vpop.f32.mrb[0].mxu0  ;;  %v3878_v21 = vpop.f32.mrb[0].mxu1 }
  0xf9   :  { %v276_v19 = vadd.f32 %v3022_v17, %v3873_v16  ;;  %v270_v20 = vpop.f32.mrb[1].mxu0  ;;  %v3881_v23 = vpop.f32.mrb[1].mxu1 }
  0xfa   :  { %v271_v22 = vadd.f32 %v3873_v16, %v270_v20  ;;  %v351_v20 = vadd.f32 %v3873_v16, %v3881_v23 }
  0xfb   :  { %v463_v24 = vmul.f32 %v3875_v18, %v276_v19  ;;  %vm430_vm1 = vcmp.ge.f32.partialorder %v276_v19, 0.0 }
  0xfc   :  { %v462_v25 = vmul.f32 %v3875_v18, %v271_v22  ;;  %v3025_v26 = vpop.f32.mrb[2].mxu0  ;;  %vm429_vm2 = vcmp.ge.f32.partialorder %v271_v22, 0.0  ;;  %v3886_v29 = vpop.f32.mrb[2].mxu1  ;;  %v478_v23 = vmul.f32 %v3875_v18, %v351_v20  ;;  %vm445_vm15 = vcmp.ge.f32.partialorder %v351_v20, 0.0 }
  0xfd   :  { %v286_v27 = vadd.f32 %v3025_v26, %v3873_v16  ;;  %v280_v28 = vpop.f32.mrb[3].mxu0  ;;  %v3889_v32 = vpop.f32.mrb[3].mxu1  ;;  %v495_v33 = vsel %vm430_vm1, %v276_v19, %v463_v24 }
  0xfe   :  { %v281_v30 = vadd.f32 %v3873_v16, %v280_v28  ;;  %v494_v31 = vsel %vm429_vm2, %v271_v22, %v462_v25 }
  0xff   :  { %v465_v34 = vmul.f32 %v3875_v18, %v286_v27  ;;  %3100 = vmatprep.mubr.f32.mxu1 %v494_v31  ;;  %vm432_vm4 = vcmp.ge.f32.partialorder %v286_v27, 0.0 }
 0x100   :  { %v464_v35 = vmul.f32 %v3875_v18, %v281_v30  ;;  %v3028_v36 = vpop.f32.mrb[4].mxu0  ;;  %3101 = vmatmul.mubr.f32.vlgmr.msra.gmra.mrb[16].mxu1 %v495_v33  ;;  %vm431_vm3 = vcmp.ge.f32.partialorder %v281_v30, 0.0  ;;  %v3894_v39 = vpop.f32.mrb[4].mxu1 }
 0x101   :  { %v296_v37 = vadd.f32 %v3028_v36, %v3873_v16  ;;  %v290_v38 = vpop.f32.mrb[5].mxu0  ;;  %v3897_v42 = vpop.f32.mrb[5].mxu1  ;;  %v497_v44 = vsel %vm432_vm4, %v286_v27, %v465_v34 }
 0x102   :  { %v291_v40 = vadd.f32 %v3873_v16, %v290_v38  ;;  %v496_v41 = vsel %vm431_vm3, %v281_v30, %v464_v35  ;;  %v361_v35 = vadd.f32 %v3873_v16, %v3889_v32  ;;  %v356_v38 = vadd.f32 %v3878_v21, %v3873_v16 }
 0x103   :  { %v467_v43 = vmul.f32 %v3875_v18, %v296_v37  ;;  %3103 = vmatprep.mubr.f32.mxu1 %v496_v41  ;;  %vm434_vm6 = vcmp.ge.f32.partialorder %v296_v37, 0.0  ;;  %v371_v32 = vadd.f32 %v3873_v16, %v3897_v42  ;;  %v366_v21 = vadd.f32 %v3886_v29, %v3873_v16 }
 0x104   :  { %v466_v45 = vmul.f32 %v3875_v18, %v291_v40  ;;  %v3031_v46 = vpop.f32.mrb[6].mxu0  ;;  %3104 = vmatmul.mubr.f32.gmra.mrb[18].mxu1 %v497_v44  ;;  %vm433_vm5 = vcmp.ge.f32.partialorder %v291_v40, 0.0  ;;  %v3902_v49 = vpop.f32.mrb[6].mxu1  ;;  %vm447_vm2 = vcmp.ge.f32.partialorder %v361_v35, 0.0  ;;  %vm446_vm3 = vcmp.ge.f32.partialorder %v356_v38, 0.0 }
 0x105   :  { %v306_v47 = vadd.f32 %v3031_v46, %v3873_v16  ;;  %v300_v48 = vpop.f32.mrb[7].mxu0  ;;  %v3905_v52 = vpop.f32.mrb[7].mxu1  ;;  %v499_v54 = vsel %vm434_vm6, %v296_v37, %v467_v43  ;;  %v480_v43 = vmul.f32 %v3875_v18, %v361_v35  ;;  %v479_v46 = vmul.f32 %v3875_v18, %v356_v38 }
 0x106   :  { %v301_v50 = vadd.f32 %v3873_v16, %v300_v48  ;;  %v498_v51 = vsel %vm433_vm5, %v291_v40, %v466_v45  ;;  %v510_v45 = vsel %vm445_vm15, %v351_v20, %v478_v23  ;;  %v482_v48 = vmul.f32 %v3875_v18, %v371_v32 }
 0x107   :  { %v469_v53 = vmul.f32 %v3875_v18, %v306_v47  ;;  %3106 = vmatprep.mubr.f32.mxu1 %v498_v51  ;;  %vm436_vm8 = vcmp.ge.f32.partialorder %v306_v47, 0.0  ;;  %v381_v51 = vadd.f32 %v3873_v16, %v3905_v52  ;;  %v376_v42 = vadd.f32 %v3894_v39, %v3873_v16 }
 0x108   :  { %v468_v55 = vmul.f32 %v3875_v18, %v301_v50  ;;  %v3034_v56 = vpop.f32.mrb[8].mxu0  ;;  %3107 = vmatmul.mubr.f32.gmra.mrb[20].mxu1 %v499_v54  ;;  %vm435_vm7 = vcmp.ge.f32.partialorder %v301_v50, 0.0  ;;  %v3910_v59 = vpop.f32.mrb[8].mxu1  ;;  %v511_v54 = vsel %vm446_vm3, %v356_v38, %v479_v46  ;;  %vm449_vm4 = vcmp.ge.f32.partialorder %v371_v32, 0.0 }
 0x109   :  { %v316_v57 = vadd.f32 %v3034_v56, %v3873_v16  ;;  %v310_v58 = vpop.f32.mrb[9].mxu0  ;;  %v3913_v62 = vpop.f32.mrb[9].mxu1  ;;  %v501_v0 = vsel %vm436_vm8, %v306_v47, %v469_v53  ;;  %v481_v53 = vmul.f32 %v3875_v18, %v366_v21  ;;  %vm448_vm5 = vcmp.ge.f32.partialorder %v366_v21, 0.0 }
 0x10a   :  { %v311_v60 = vadd.f32 %v3873_v16, %v310_v58  ;;  %v500_v61 = vsel %vm435_vm7, %v301_v50, %v468_v55  ;;  %v512_v50 = vsel %vm447_vm2, %v361_v35, %v480_v43  ;;  %v386_v29 = vadd.f32 %v3902_v49, %v3873_v16 }
 0x10b   :  { %v471_v63 = vmul.f32 %v3875_v18, %v316_v57  ;;  %3109 = vmatprep.mubr.f32.mxu1 %v500_v61  ;;  %vm438_vm10 = vcmp.ge.f32.partialorder %v316_v57, 0.0  ;;  %v484_v55 = vmul.f32 %v3875_v18, %v381_v51  ;;  %v514_v56 = vsel %vm449_vm4, %v371_v32, %v482_v48 }
 0x10c   :  { %v470_v1 = vmul.f32 %v3875_v18, %v311_v60  ;;  %v3037_v2 = vpop.f32.mrb[10].mxu0  ;;  %3110 = vmatmul.mubr.f32.gmra.mrb[22].mxu1 %v501_v0  ;;  %vm437_vm9 = vcmp.ge.f32.partialorder %v311_v60, 0.0  ;;  %v3918_v5 = vpop.f32.mrb[10].mxu1  ;;  %v483_v52 = vmul.f32 %v3875_v18, %v376_v42  ;;  %v513_v58 = vsel %vm448_vm5, %v366_v21, %v481_v53 }
 0x10d   :  { %v326_v3 = vadd.f32 %v3037_v2, %v3873_v16  ;;  %v320_v4 = vpop.f32.mrb[11].mxu0  ;;  %v3921_v8 = vpop.f32.mrb[11].mxu1  ;;  %v503_v10 = vsel %vm438_vm10, %v316_v57, %v471_v63  ;;  %v391_v57 = vadd.f32 %v3873_v16, %v3913_v62  ;;  %vm451_vm6 = vcmp.ge.f32.partialorder %v381_v51, 0.0 }
 0x10e   :  { %v321_v6 = vadd.f32 %v3873_v16, %v320_v4  ;;  %v502_v7 = vsel %vm437_vm9, %v311_v60, %v470_v1  ;;  %vm450_vm7 = vcmp.ge.f32.partialorder %v376_v42, 0.0  ;;  %v485_v39 = vmul.f32 %v3875_v18, %v386_v29 }
 0x10f   :  { %v473_v9 = vmul.f32 %v3875_v18, %v326_v3  ;;  %3112 = vmatprep.mubr.f32.mxu1 %v502_v7  ;;  %vm440_vm12 = vcmp.ge.f32.partialorder %v326_v3, 0.0  ;;  %v396_v60 = vadd.f32 %v3910_v59, %v3873_v16  ;;  %v486_v49 = vmul.f32 %v3875_v18, %v391_v57 }
 0x110   :  { %v472_v11 = vmul.f32 %v3875_v18, %v321_v6  ;;  %v3040_v12 = vpop.f32.mrb[12].mxu0  ;;  %3113 = vmatmul.mubr.f32.gmra.mrb[24].mxu1 %v503_v10  ;;  %vm439_vm11 = vcmp.ge.f32.partialorder %v321_v6, 0.0  ;;  %v3926_v15 = vpop.f32.mrb[12].mxu1  ;;  %v516_v61 = vsel %vm451_vm6, %v381_v51, %v484_v55  ;;  %vm452_vm8 = vcmp.ge.f32.partialorder %v386_v29, 0.0 }
 0x111   :  { %v336_v13 = vadd.f32 %v3040_v12, %v3873_v16  ;;  %v330_v14 = vpop.f32.mrb[13].mxu0  ;;  %v3931_v22 = vpop.f32.mrb[13].mxu1  ;;  %v505_v25 = vsel %vm440_vm12, %v326_v3, %v473_v9  ;;  %v401_v63 = vadd.f32 %v3873_v16, %v3921_v8  ;;  %v515_v62 = vsel %vm450_vm7, %v376_v42, %v483_v52 }
 0x112   :  { %v331_v17 = vadd.f32 %v3873_v16, %v330_v14  ;;  %v504_v19 = vsel %vm439_vm11, %v321_v6, %v472_v11  ;;  %vm453_vm9 = vcmp.ge.f32.partialorder %v391_v57, 0.0  ;;  %v487_v0 = vmul.f32 %v3875_v18, %v396_v60 }
 0x113   :  { %v475_v24 = vmul.f32 %v3875_v18, %v336_v13  ;;  %3115 = vmatprep.mubr.f32.mxu1 %v504_v19  ;;  %vm442_vm14 = vcmp.ge.f32.partialorder %v336_v13, 0.0  ;;  %v517_v1 = vsel %vm452_vm8, %v386_v29, %v485_v39  ;;  %v406_v2 = vadd.f32 %v3918_v5, %v3873_v16 }
 0x114   :  { %v474_v26 = vmul.f32 %v3875_v18, %v331_v17  ;;  %v3043_v27 = vpop.f32.mrb[14].mxu0  ;;  %3116 = vmatmul.mubr.f32.gmra.mrb[26].mxu1 %v505_v25  ;;  %vm441_vm13 = vcmp.ge.f32.partialorder %v331_v17, 0.0  ;;  %v3936_v31 = vpop.f32.mrb[14].mxu1  ;;  %v518_v3 = vsel %vm453_vm9, %v391_v57, %v486_v49  ;;  %vm454_vm10 = vcmp.ge.f32.partialorder %v396_v60, 0.0 }
 0x115   :  { %v346_v28 = vadd.f32 %v3043_v27, %v3873_v16  ;;  %v340_v30 = vpop.f32.mrb[15].mxu0  ;;  %v3942_v36 = vpop.f32.mrb[15].mxu1  ;;  %v507_v40 = vsel %vm442_vm14, %v336_v13, %v475_v24  ;;  %v488_v59 = vmul.f32 %v3875_v18, %v401_v63  ;;  %v411_v4 = vadd.f32 %v3873_v16, %v3931_v22  ;;  %v886_v24 = vld [vmem:[%s4929_s6 + $0x78] sm:$0xff] }
 0x116   :  { %v341_v33 = vadd.f32 %v3873_v16, %v340_v30  ;;  %v506_v34 = vsel %vm441_vm13, %v331_v17, %v474_v26  ;;  %vm455_vm11 = vcmp.ge.f32.partialorder %v401_v63, 0.0  ;;  %v519_v6 = vsel %vm454_vm10, %v396_v60, %v487_v0 }
 0x117   :  { %v477_v37 = vmul.f32 %v3875_v18, %v346_v28  ;;  %3118 = vmatprep.mubr.f32.mxu1 %v506_v34  ;;  %vm444_vm1 = vcmp.ge.f32.partialorder %v346_v28, 0.0  ;;  %v489_v7 = vmul.f32 %v3875_v18, %v406_v2  ;;  %v416_v8 = vadd.f32 %v3926_v15, %v3873_v16 }
 0x118   :  { %v476_v41 = vmul.f32 %v3875_v18, %v341_v33  ;;  %3119 = vmatmul.mubr.f32.gmra.mrb[28].mxu1 %v507_v40  ;;  %vm443_vm0 = vcmp.ge.f32.partialorder %v341_v33, 0.0  ;;  %v520_v9 = vsel %vm455_vm11, %v401_v63, %v488_v59  ;;  %vm456_vm12 = vcmp.ge.f32.partialorder %v406_v2, 0.0 }
 0x119   :  { %v509_v47 = vsel %vm444_vm1, %v346_v28, %v477_v37  ;;  %v490_v5 = vmul.f32 %v3875_v18, %v411_v4  ;;  %v421_v10 = vadd.f32 %v3873_v16, %v3942_v36  ;;  %vm457_vm13 = vcmp.ge.f32.partialorder %v411_v4, 0.0 }
 0x11a   :  { %v508_v44 = vsel %vm443_vm0, %v341_v33, %v476_v41  ;;  %v491_v11 = vmul.f32 %v3875_v18, %v416_v8  ;;  %v521_v12 = vsel %vm456_vm12, %v406_v2, %v489_v7  ;;  %v426_v13 = vadd.f32 %v3936_v31, %v3873_v16  ;;  %v885_v16 = vld [vmem:[%s4929_s6 + $0x70] sm:$0xff] }
 0x11b   :  { %3121 = vmatprep.mubr.f32.mxu1 %v508_v44  ;;  %v522_v14 = vsel %vm457_vm13, %v411_v4, %v490_v5  ;;  %v492_v17 = vmul.f32 %v3875_v18, %v421_v10  ;;  %vm458_vm14 = vcmp.ge.f32.partialorder %v416_v8, 0.0  ;;  %vm459_vm15 = vcmp.ge.f32.partialorder %v421_v10, 0.0 }
 0x11c   :  { %3122 = vmatmul.mubr.f32.gmra.mrb[30].mxu1 %v509_v47  ;;  %v493_v15 = vmul.f32 %v3875_v18, %v426_v13  ;;  %v523_v19 = vsel %vm458_vm14, %v416_v8, %v491_v11  ;;  %vm460_vm0 = vcmp.ge.f32.partialorder %v426_v13, 0.0  ;;  %v3330_v25 = vpack.c.bf16 %v886_v24, %v885_v16  ;;  %v3998_v18 = vld [vmem:[%s4928_s5] ss:$0 sm:$0xff] }
 0x11d   :  { %3124 = vmatprep.mubr.f32.mxu1 %v510_v45  ;;  %v524_v20 = vsel %vm459_vm15, %v421_v10, %v492_v17  ;;  %v4000_v27 = vstv %s2827_s21 }
 0x11e   :  { %v525_v22 = vsel %vm460_vm0, %v426_v13, %v493_v15  ;;  %3331 = vmatprep.subr.bf16.mxu0 %v3330_v25 }
 0x11f   :  { %3333 = vmatpush3.bf16.msra.mxu0 %v3330_v25 }
 0x120   :  { %3125 = vmatmul.mubr.f32.gmra.mrb[32].mxu1 %v511_v54 }
 0x121   :  { %3127 = vmatprep.mubr.f32.mxu1 %v512_v50 }
 0x124   :  { %3128 = vmatmul.mubr.f32.gmra.mrb[34].mxu1 %v513_v58 }
 0x125   :  { %3130 = vmatprep.mubr.f32.mxu1 %v514_v56 }
 0x128   :  { %3131 = vmatmul.mubr.f32.gmra.mrb[36].mxu1 %v515_v62 }
 0x129   :  { %3133 = vmatprep.mubr.f32.mxu1 %v516_v61 }
 0x12c   :  { %3134 = vmatmul.mubr.f32.gmra.mrb[38].mxu1 %v517_v1 }
 0x12d   :  { %3136 = vmatprep.mubr.f32.mxu1 %v518_v3 }
 0x130   :  { %3137 = vmatmul.mubr.f32.gmra.mrb[40].mxu1 %v519_v6 }
 0x131   :  { %3139 = vmatprep.mubr.f32.mxu1 %v520_v9 }
 0x134   :  { %3140 = vmatmul.mubr.f32.gmra.mrb[42].mxu1 %v521_v12 }
 0x135   :  { %3142 = vmatprep.mubr.f32.mxu1 %v522_v14 }
 0x138   :  { %3143 = vmatmul.mubr.f32.gmra.mrb[44].mxu1 %v523_v19 }
 0x139   :  { %3145 = vmatprep.mubr.f32.mxu1 %v524_v20 }
 0x13c   :  { %3146 = vmatmul.mubr.f32.gmra.mrb[46].mxu1 %v525_v22 }
 0x1d3   :  { %v3102_v26 = vpop.f32.mrb[16].mxu1 }
 0x1d4   :  { %v621_v28 = vadd.f32 %v3102_v26, %v3998_v18  ;;  %v615_v30 = vpop.f32.mrb[17].mxu1 }
 0x1d5   :  { %v616_v31 = vadd.f32 %v3998_v18, %v615_v30 }
 0x1d6   :  { %v808_v33 = vmul.f32 %v4000_v27, %v621_v28  ;;  %vm775_vm1 = vcmp.ge.f32.partialorder %v621_v28, 0.0 }
 0x1d7   :  { %v807_v23 = vmul.f32 %v4000_v27, %v616_v31  ;;  %v3105_v34 = vpop.f32.mrb[18].mxu1  ;;  %vm774_vm2 = vcmp.ge.f32.partialorder %v616_v31, 0.0 }
 0x1d8   :  { %v631_v35 = vadd.f32 %v3105_v34, %v3998_v18  ;;  %v625_v36 = vpop.f32.mrb[19].mxu1  ;;  %v4010_v40 = vsel %vm775_vm1, %v621_v28, %v808_v33 }
 0x1d9   :  { %v626_v37 = vadd.f32 %v3998_v18, %v625_v36  ;;  %v4008_v38 = vsel %vm774_vm2, %v616_v31, %v807_v23  ;;  %4973 = vst [vmem:[#allocation9_spill] sm:$0xff] %v4010_v40 }
 0x1da   :  { %4972 = vst [vmem:[#allocation8_spill] sm:$0xff] %v4008_v38  ;;  %v810_v41 = vmul.f32 %v4000_v27, %v631_v35  ;;  %3180 = vmatprep.mubr.f32.mxu0 %v4008_v38  ;;  %vm777_vm4 = vcmp.ge.f32.partialorder %v631_v35, 0.0 }
 0x1db   :  { %v809_v43 = vmul.f32 %v4000_v27, %v626_v37  ;;  %v3108_v44 = vpop.f32.mrb[20].mxu1  ;;  %3181 = vmatmul.mubr.f32.vlgmr.msra.gmra.mrb[16].mxu0 %v4010_v40  ;;  %vm776_vm3 = vcmp.ge.f32.partialorder %v626_v37, 0.0 }
 0x1dc   :  { %v641_v45 = vadd.f32 %v3108_v44, %v3998_v18  ;;  %v635_v32 = vpop.f32.mrb[21].mxu1  ;;  %v4022_v48 = vsel %vm777_vm4, %v631_v35, %v810_v41 }
 0x1dd   :  { %v636_v46 = vadd.f32 %v3998_v18, %v635_v32  ;;  %v4018_v21 = vsel %vm776_vm3, %v626_v37, %v809_v43  ;;  %4975 = vst [vmem:[#allocation11_spill] sm:$0xff] %v4022_v48 }
 0x1de   :  { %4974 = vst [vmem:[#allocation10_spill] sm:$0xff] %v4018_v21  ;;  %v812_v47 = vmul.f32 %v4000_v27, %v641_v45  ;;  %3183 = vmatprep.mubr.f32.mxu0 %v4018_v21  ;;  %vm779_vm6 = vcmp.ge.f32.partialorder %v641_v45, 0.0 }
 0x1df   :  { %v811_v50 = vmul.f32 %v4000_v27, %v636_v46  ;;  %v3111_v51 = vpop.f32.mrb[22].mxu1  ;;  %3184 = vmatmul.mubr.f32.gmra.mrb[18].mxu0 %v4022_v48  ;;  %vm778_vm5 = vcmp.ge.f32.partialorder %v636_v46, 0.0 }
 0x1e0   :  { %v651_v53 = vadd.f32 %v3111_v51, %v3998_v18  ;;  %v645_v42 = vpop.f32.mrb[23].mxu1  ;;  %v4032_v56 = vsel %vm779_vm6, %v641_v45, %v812_v47 }
 0x1e1   :  { %v646_v54 = vadd.f32 %v3998_v18, %v645_v42  ;;  %v4028_v29 = vsel %vm778_vm5, %v636_v46, %v811_v50  ;;  %4977 = vst [vmem:[#allocation13_spill] sm:$0xff] %v4032_v56 }
 0x1e2   :  { %4976 = vst [vmem:[#allocation12_spill] sm:$0xff] %v4028_v29  ;;  %v814_v55 = vmul.f32 %v4000_v27, %v651_v53  ;;  %3186 = vmatprep.mubr.f32.mxu0 %v4028_v29  ;;  %vm781_vm8 = vcmp.ge.f32.partialorder %v651_v53, 0.0 }
 0x1e3   :  { %v813_v57 = vmul.f32 %v4000_v27, %v646_v54  ;;  %v3114_v52 = vpop.f32.mrb[24].mxu1  ;;  %3187 = vmatmul.mubr.f32.gmra.mrb[20].mxu0 %v4032_v56  ;;  %vm780_vm7 = vcmp.ge.f32.partialorder %v646_v54, 0.0 }
 0x1e4   :  { %v661_v58 = vadd.f32 %v3114_v52, %v3998_v18  ;;  %v655_v39 = vpop.f32.mrb[25].mxu1  ;;  %v4042_v63 = vsel %vm781_vm8, %v651_v53, %v814_v55 }
 0x1e5   :  { %v656_v60 = vadd.f32 %v3998_v18, %v655_v39  ;;  %v4038_v49 = vsel %vm780_vm7, %v646_v54, %v813_v57  ;;  %4979 = vst [vmem:[#allocation15_spill] sm:$0xff] %v4042_v63 }
 0x1e6   :  { %4978 = vst [vmem:[#allocation14_spill] sm:$0xff] %v4038_v49  ;;  %v816_v61 = vmul.f32 %v4000_v27, %v661_v58  ;;  %3189 = vmatprep.mubr.f32.mxu0 %v4038_v49  ;;  %vm783_vm10 = vcmp.ge.f32.partialorder %v661_v58, 0.0 }
 0x1e7   :  { %v815_v62 = vmul.f32 %v4000_v27, %v656_v60  ;;  %v3117_v0 = vpop.f32.mrb[26].mxu1  ;;  %3190 = vmatmul.mubr.f32.gmra.mrb[22].mxu0 %v4042_v63  ;;  %vm782_vm9 = vcmp.ge.f32.partialorder %v656_v60, 0.0 }
 0x1e8   :  { %v671_v1 = vadd.f32 %v3117_v0, %v3998_v18  ;;  %v665_v2 = vpop.f32.mrb[27].mxu1  ;;  %v4052_v6 = vsel %vm783_vm10, %v661_v58, %v816_v61 }
 0x1e9   :  { %v666_v3 = vadd.f32 %v3998_v18, %v665_v2  ;;  %v4048_v59 = vsel %vm782_vm9, %v656_v60, %v815_v62  ;;  %4981 = vst [vmem:[#allocation17_spill] sm:$0xff] %v4052_v6 }
 0x1ea   :  { %4980 = vst [vmem:[#allocation16_spill] sm:$0xff] %v4048_v59  ;;  %v818_v4 = vmul.f32 %v4000_v27, %v671_v1  ;;  %3192 = vmatprep.mubr.f32.mxu0 %v4048_v59  ;;  %vm785_vm12 = vcmp.ge.f32.partialorder %v671_v1, 0.0 }
 0x1eb   :  { %v817_v7 = vmul.f32 %v4000_v27, %v666_v3  ;;  %v3120_v8 = vpop.f32.mrb[28].mxu1  ;;  %3193 = vmatmul.mubr.f32.gmra.mrb[24].mxu0 %v4052_v6  ;;  %vm784_vm11 = vcmp.ge.f32.partialorder %v666_v3, 0.0 }
 0x1ec   :  { %v681_v9 = vadd.f32 %v3120_v8, %v3998_v18  ;;  %v675_v5 = vpop.f32.mrb[29].mxu1  ;;  %v4062_v13 = vsel %vm785_vm12, %v671_v1, %v818_v4 }
 0x1ed   :  { %v676_v10 = vadd.f32 %v3998_v18, %v675_v5  ;;  %v4058_v11 = vsel %vm784_vm11, %v666_v3, %v817_v7  ;;  %4983 = vst [vmem:[#allocation19_spill] sm:$0xff] %v4062_v13 }
 0x1ee   :  { %4982 = vst [vmem:[#allocation18_spill] sm:$0xff] %v4058_v11  ;;  %v820_v12 = vmul.f32 %v4000_v27, %v681_v9  ;;  %3195 = vmatprep.mubr.f32.mxu0 %v4058_v11  ;;  %vm787_vm14 = vcmp.ge.f32.partialorder %v681_v9, 0.0 }
 0x1ef   :  { %v819_v14 = vmul.f32 %v4000_v27, %v676_v10  ;;  %v3123_v17 = vpop.f32.mrb[30].mxu1  ;;  %3196 = vmatmul.mubr.f32.gmra.mrb[26].mxu0 %v4062_v13  ;;  %vm786_vm13 = vcmp.ge.f32.partialorder %v676_v10, 0.0 }
 0x1f0   :  { %v691_v15 = vadd.f32 %v3123_v17, %v3998_v18  ;;  %v685_v19 = vpop.f32.mrb[31].mxu1  ;;  %v4072_v24 = vsel %vm787_vm14, %v681_v9, %v820_v12 }
 0x1f1   :  { %v686_v20 = vadd.f32 %v3998_v18, %v685_v19  ;;  %v4068_v22 = vsel %vm786_vm13, %v676_v10, %v819_v14  ;;  %4985 = vst [vmem:[#allocation21_spill] sm:$0xff] %v4072_v24 }
 0x1f2   :  { %4984 = vst [vmem:[#allocation20_spill] sm:$0xff] %v4068_v22  ;;  %v822_v16 = vmul.f32 %v4000_v27, %v691_v15  ;;  %3198 = vmatprep.mubr.f32.mxu0 %v4068_v22  ;;  %vm789_vm0 = vcmp.ge.f32.partialorder %v691_v15, 0.0 }
 0x1f3   :  { %v821_v25 = vmul.f32 %v4000_v27, %v686_v20  ;;  %v3126_v26 = vpop.f32.mrb[32].mxu1  ;;  %3199 = vmatmul.mubr.f32.gmra.mrb[28].mxu0 %v4072_v24  ;;  %vm788_vm15 = vcmp.ge.f32.partialorder %v686_v20, 0.0 }
 0x1f4   :  { %v701_v28 = vadd.f32 %v3126_v26, %v3998_v18  ;;  %v695_v30 = vpop.f32.mrb[33].mxu1  ;;  %v4082_v34 = vsel %vm789_vm0, %v691_v15, %v822_v16 }
 0x1f5   :  { %v696_v31 = vadd.f32 %v3998_v18, %v695_v30  ;;  %v4078_v33 = vsel %vm788_vm15, %v686_v20, %v821_v25  ;;  %4987 = vst [vmem:[#allocation23_spill] sm:$0xff] %v4082_v34 }
 0x1f6   :  { %4986 = vst [vmem:[#allocation22_spill] sm:$0xff] %v4078_v33  ;;  %v824_v23 = vmul.f32 %v4000_v27, %v701_v28  ;;  %3201 = vmatprep.mubr.f32.mxu0 %v4078_v33  ;;  %vm791_vm2 = vcmp.ge.f32.partialorder %v701_v28, 0.0 }
 0x1f7   :  { %v823_v35 = vmul.f32 %v4000_v27, %v696_v31  ;;  %v3129_v36 = vpop.f32.mrb[34].mxu1  ;;  %3202 = vmatmul.mubr.f32.gmra.mrb[30].mxu0 %v4082_v34  ;;  %vm790_vm1 = vcmp.ge.f32.partialorder %v696_v31, 0.0 }
 0x1f8   :  { %v711_v37 = vadd.f32 %v3129_v36, %v3998_v18  ;;  %v705_v41 = vpop.f32.mrb[35].mxu1  ;;  %v4092_v32 = vsel %vm791_vm2, %v701_v28, %v824_v23  ;;  %vm1451_vm2 = vcmask 1042434  }
 0x1f9   :  { %v706_v43 = vadd.f32 %v3998_v18, %v705_v41  ;;  %v4088_v44 = vsel %vm790_vm1, %v696_v31, %v823_v35  ;;  %4989 = vst [vmem:[#allocation25_spill] sm:$0xff] %v4092_v32  ;;  %vm1449_vm1 = vcmask 1041409  }
 0x1fa   :  { %4988 = vst [vmem:[#allocation24_spill] sm:$0xff] %v4088_v44  ;;  %v826_v45 = vmul.f32 %v4000_v27, %v711_v37  ;;  %3204 = vmatprep.mubr.f32.mxu0 %v4088_v44  ;;  %vm793_vm4 = vcmp.ge.f32.partialorder %v711_v37, 0.0 }
 0x1fb   :  { %v825_v46 = vmul.f32 %v4000_v27, %v706_v43  ;;  %v3132_v47 = vpop.f32.mrb[36].mxu1  ;;  %3205 = vmatmul.mubr.f32.gmra.mrb[32].mxu0 %v4092_v32  ;;  %vm792_vm3 = vcmp.ge.f32.partialorder %v706_v43, 0.0 }
 0x1fc   :  { %v721_v50 = vadd.f32 %v3132_v47, %v3998_v18  ;;  %v715_v51 = vpop.f32.mrb[37].mxu1  ;;  %v4102_v55 = vsel %vm793_vm4, %v711_v37, %v826_v45  ;;  %vm1455_vm4 = vcmask 1044484  }
 0x1fd   :  { %v716_v53 = vadd.f32 %v3998_v18, %v715_v51  ;;  %v4098_v42 = vsel %vm792_vm3, %v706_v43, %v825_v46  ;;  %4991 = vst [vmem:[#allocation27_spill] sm:$0xff] %v4102_v55  ;;  %vm1453_vm3 = vcmask 1043459  }
 0x1fe   :  { %4990 = vst [vmem:[#allocation26_spill] sm:$0xff] %v4098_v42  ;;  %v828_v54 = vmul.f32 %v4000_v27, %v721_v50  ;;  %3207 = vmatprep.mubr.f32.mxu0 %v4098_v42  ;;  %vm795_vm6 = vcmp.ge.f32.partialorder %v721_v50, 0.0 }
 0x1ff   :  { %v827_v57 = vmul.f32 %v4000_v27, %v716_v53  ;;  %v3135_v52 = vpop.f32.mrb[38].mxu1  ;;  %3208 = vmatmul.mubr.f32.gmra.mrb[34].mxu0 %v4102_v55  ;;  %vm794_vm5 = vcmp.ge.f32.partialorder %v716_v53, 0.0 }
 0x200   :  { %v731_v58 = vadd.f32 %v3135_v52, %v3998_v18  ;;  %v725_v39 = vpop.f32.mrb[39].mxu1  ;;  %v4112_v0 = vsel %vm795_vm6, %v721_v50, %v828_v54  ;;  %vm1459_vm6 = vcmask 1046534  }
 0x201   :  { %v726_v60 = vadd.f32 %v3998_v18, %v725_v39  ;;  %v4108_v61 = vsel %vm794_vm5, %v716_v53, %v827_v57  ;;  %4993 = vst [vmem:[#allocation29_spill] sm:$0xff] %v4112_v0  ;;  %vm1457_vm5 = vcmask 1045509  }
 0x202   :  { %4992 = vst [vmem:[#allocation28_spill] sm:$0xff] %v4108_v61  ;;  %v830_v62 = vmul.f32 %v4000_v27, %v731_v58  ;;  %3210 = vmatprep.mubr.f32.mxu0 %v4108_v61  ;;  %vm797_vm8 = vcmp.ge.f32.partialorder %v731_v58, 0.0 }
 0x203   :  { %v829_v1 = vmul.f32 %v4000_v27, %v726_v60  ;;  %v3138_v2 = vpop.f32.mrb[40].mxu1  ;;  %3211 = vmatmul.mubr.f32.gmra.mrb[36].mxu0 %v4112_v0  ;;  %vm796_vm7 = vcmp.ge.f32.partialorder %v726_v60, 0.0 }
 0x204   :  { %v741_v3 = vadd.f32 %v3138_v2, %v3998_v18  ;;  %v735_v4 = vpop.f32.mrb[41].mxu1  ;;  %v4122_v5 = vsel %vm797_vm8, %v731_v58, %v830_v62  ;;  %vm1488_vm8 = vcmask 64512  }
 0x205   :  { %v736_v7 = vadd.f32 %v3998_v18, %v735_v4  ;;  %v4118_v8 = vsel %vm796_vm7, %v726_v60, %v829_v1  ;;  %4995 = vst [vmem:[#allocation31_spill] sm:$0xff] %v4122_v5  ;;  %vm1461_vm7 = vcmask 1047559  }
 0x206   :  { %4994 = vst [vmem:[#allocation30_spill] sm:$0xff] %v4118_v8  ;;  %v832_v9 = vmul.f32 %v4000_v27, %v741_v3  ;;  %3213 = vmatprep.mubr.f32.mxu0 %v4118_v8  ;;  %vm799_vm10 = vcmp.ge.f32.partialorder %v741_v3, 0.0 }
 0x207   :  { %v831_v10 = vmul.f32 %v4000_v27, %v736_v7  ;;  %3214 = vmatmul.mubr.f32.gmra.mrb[38].mxu0 %v4122_v5  ;;  %vm798_vm9 = vcmp.ge.f32.partialorder %v736_v7, 0.0  ;;  %v3141_v12 = vpop.f32.mrb[42].mxu1 }
 0x208   :  { %v751_v14 = vadd.f32 %v3141_v12, %v3998_v18  ;;  %v745_v17 = vpop.f32.mrb[43].mxu1  ;;  %v4131_v20 = vsel %vm799_vm10, %v741_v3, %v832_v9 }
 0x209   :  { %v4127_v15 = vsel %vm798_vm9, %v736_v7, %v831_v10  ;;  %v746_v19 = vadd.f32 %v3998_v18, %v745_v17  ;;  %4997 = vst [vmem:[#allocation33_spill] sm:$0xff] %v4131_v20  ;;  %v4174_v7 = vld [vmem:[%s4931_s8] ss:$0 sm:$0xff]  ;;  %s2828_s8 = sld [smem:[#allocation2 + $0x2]] }
 0x20a   :  { %4996 = vst [vmem:[#allocation32_spill] sm:$0xff] %v4127_v15  ;;  %3216 = vmatprep.mubr.f32.mxu0 %v4127_v15  ;;  %v834_v16 = vmul.f32 %v4000_v27, %v751_v14  ;;  %vm801_vm11 = vcmp.ge.f32.partialorder %v751_v14, 0.0 }
 0x20b   :  { %3217 = vmatmul.mubr.f32.gmra.mrb[40].mxu0 %v4131_v20  ;;  %v833_v25 = vmul.f32 %v4000_v27, %v746_v19  ;;  %vm800_vm12 = vcmp.ge.f32.partialorder %v746_v19, 0.0  ;;  %v3144_v26 = vpop.f32.mrb[44].mxu1 }
 0x20c   :  { %v761_v28 = vadd.f32 %v3144_v26, %v3998_v18  ;;  %v4137_v30 = vsel %vm801_vm11, %v751_v14, %v834_v16  ;;  %v755_v31 = vpop.f32.mrb[45].mxu1 }
 0x20d   :  { %4998 = vst [vmem:[#allocation34_spill] sm:$0xff] %v4137_v30  ;;  %v4139_v23 = vsel %vm800_vm12, %v746_v19, %v833_v25  ;;  %v756_v35 = vadd.f32 %v3998_v18, %v755_v31 }
 0x20e   :  { %4999 = vst [vmem:[#allocation35_spill] sm:$0xff] %v4139_v23  ;;  %3219 = vmatprep.mubr.f32.mxu0 %v4139_v23  ;;  %v836_v36 = vmul.f32 %v4000_v27, %v761_v28  ;;  %vm803_vm13 = vcmp.ge.f32.partialorder %v761_v28, 0.0 }
 0x20f   :  { %3220 = vmatmul.mubr.f32.gmra.mrb[42].mxu0 %v4137_v30  ;;  %v835_v37 = vmul.f32 %v4000_v27, %v756_v35  ;;  %v3147_v41 = vpop.f32.mrb[46].mxu1  ;;  %vm802_vm14 = vcmp.ge.f32.partialorder %v756_v35, 0.0 }
 0x210   :  { %v771_v43 = vadd.f32 %v3147_v41, %v3998_v18  ;;  %v765_v45 = vpop.f32.mrb[47].mxu1  ;;  %v4147_v46 = vsel %vm803_vm13, %v761_v28, %v836_v36 }
 0x211   :  { %5000 = vst [vmem:[#allocation36_spill] sm:$0xff] %v4147_v46  ;;  %v4149_v47 = vsel %vm802_vm14, %v756_v35, %v835_v37  ;;  %v766_v50 = vadd.f32 %v3998_v18, %v765_v45  ;;  %v4165_v18 = vld [vmem:[%s4930_s7] ss:$0 sm:$0xff] }
 0x212   :  { %5001 = vst [vmem:[#allocation37_spill] sm:$0xff] %v4149_v47  ;;  %v838_v51 = vmul.f32 %v4000_v27, %v771_v43  ;;  %3222 = vmatprep.mubr.f32.mxu0 %v4149_v47  ;;  %vm805_vm15 = vcmp.ge.f32.partialorder %v771_v43, 0.0 }
 0x213   :  { %v837_v53 = vmul.f32 %v4000_v27, %v766_v50  ;;  %3223 = vmatmul.mubr.f32.gmra.mrb[44].mxu0 %v4147_v46  ;;  %vm804_vm0 = vcmp.ge.f32.partialorder %v766_v50, 0.0 }
 0x214   :  { %v4156_v54 = vsel %vm805_vm15, %v771_v43, %v838_v51 }
 0x215   :  { %5002 = vst [vmem:[#allocation38_spill] sm:$0xff] %v4156_v54  ;;  %v4158_v57 = vsel %vm804_vm0, %v766_v50, %v837_v53 }
 0x216   :  { %5003 = vst [vmem:[#allocation39_spill] sm:$0xff] %v4158_v57  ;;  %3225 = vmatprep.mubr.f32.mxu0 %v4158_v57 }
 0x217   :  { %3226 = vmatmul.mubr.f32.gmra.mrb[46].mxu0 %v4156_v54 }
 0x2ae   :  { %v3182_v52 = vpop.f32.mrb[16].mxu0 }
 0x2af   :  { %v966_v58 = vadd.f32 %v3182_v52, %v4165_v18  ;;  %v960_v27 = vpop.f32.mrb[17].mxu0 }
 0x2b0   :  { %v961_v39 = vadd.f32 %v4165_v18, %v960_v27 }
 0x2b1   :  { %3391 = vtanh.f32 %v966_v58 }
 0x2b2   :  { %v3185_v60 = vpop.f32.mrb[18].mxu0  ;;  %3393 = vtanh.f32 %v961_v39 }
 0x2b3   :  { %v976_v62 = vadd.f32 %v3185_v60, %v4165_v18  ;;  %v970_v1 = vpop.f32.mrb[19].mxu0 }
 0x2b4   :  { %v971_v3 = vadd.f32 %v4165_v18, %v970_v1 }
 0x2b5   :  { %3395 = vtanh.f32 %v976_v62 }
 0x2b6   :  { %v3188_v2 = vpop.f32.mrb[20].mxu0  ;;  %3397 = vtanh.f32 %v971_v3 }
 0x2b7   :  { %v980_v4 = vpop.f32.mrb[21].mxu0  ;;  %v986_v12 = vadd.f32 %v3188_v2, %v4165_v18 }
 0x2b8   :  { %v981_v25 = vadd.f32 %v4165_v18, %v980_v4 }
 0x2b9   :  { %3399 = vtanh.f32 %v986_v12 }
 0x2ba   :  { %v3191_v9 = vpop.f32.mrb[22].mxu0 }
 0x2bb   :  { %v3392_v10 = vpop.eup %3391  ;;  %v990_v14 = vpop.f32.mrb[23].mxu0  ;;  %v996_v37 = vadd.f32 %v3191_v9, %v4165_v18 }
 0x2bc   :  { %v1159_v17 = vmul.f32 %v3392_v10, %v4174_v7  ;;  %v3394_v19 = vpop.eup %3393  ;;  %v991_v52 = vadd.f32 %v4165_v18, %v990_v14 }
 0x2bd   :  { %v1158_v31 = vmul.f32 %v3394_v19, %v4174_v7 }
 0x2be   :  { %1192 = vadd.xlane.f32.xlu0 %v1159_v17  ;;  %v3194_v16 = vpop.f32.mrb[24].mxu0 }
 0x2bf   :  { %v1000_v26 = vpop.f32.mrb[25].mxu0  ;;  %v3396_v35 = vpop.eup %3395  ;;  %v1006_v1 = vadd.f32 %v3194_v16, %v4165_v18 }
 0x2c0   :  { %v1001_v28 = vadd.f32 %v4165_v18, %v1000_v26  ;;  %v1161_v50 = vmul.f32 %v3396_v35, %v4174_v7  ;;  %v3398_v51 = vpop.eup %3397 }
 0x2c1   :  { %v1160_v39 = vmul.f32 %v3398_v51, %v4174_v7 }
 0x2c2   :  { %3401 = vtanh.f32 %v1001_v28  ;;  %v3197_v36 = vpop.f32.mrb[26].mxu0  ;;  %1190 = vadd.xlane.f32.xlu0 %v1158_v31 }
 0x2c3   :  { %3403 = vtanh.f32 %v981_v25  ;;  %v1016_v41 = vadd.f32 %v3197_v36, %v4165_v18  ;;  %v1010_v43 = vpop.f32.mrb[27].mxu0  ;;  %v3400_v60 = vpop.eup %3399 }
 0x2c4   :  { %v1011_v45 = vadd.f32 %v4165_v18, %v1010_v43  ;;  %v1163_v9 = vmul.f32 %v3400_v60, %v4174_v7 }
 0x2c5   :  { %3405 = vtanh.f32 %v1016_v41 }
 0x2c6   :  { %v3200_v53 = vpop.f32.mrb[28].mxu0  ;;  %1196 = vadd.xlane.f32.xlu0 %v1161_v50  ;;  %3407 = vtanh.f32 %v996_v37 }
 0x2c7   :  { %v1020_v58 = vpop.f32.mrb[29].mxu0  ;;  %3409 = vtanh.f32 %v1011_v45  ;;  %v1026_v27 = vadd.f32 %v3200_v53, %v4165_v18 }
 0x2c8   :  { %3411 = vtanh.f32 %v991_v52  ;;  %v1021_v4 = vadd.f32 %v4165_v18, %v1020_v58 }
 0x2c9   :  { %3413 = vtanh.f32 %v1026_v27 }
 0x2ca   :  { %v4188_v62 = vpop.f32.mrb[30].mxu0  ;;  %1194 = vadd.xlane.f32.xlu0 %v1160_v39  ;;  %3415 = vtanh.f32 %v1006_v1 }
 0x2cb   :  { %v1030_v2 = vpop.f32.mrb[31].mxu0  ;;  %3417 = vtanh.f32 %v1021_v4 }
 0x2cc   :  { %v3402_v3 = vpop.eup %3401  ;;  %v1031_v25 = vadd.f32 %v4165_v18, %v1030_v2 }
 0x2cd   :  { %v3404_v10 = vpop.eup %3403  ;;  %v1166_v12 = vmul.f32 %v3402_v3, %v4174_v7 }
 0x2ce   :  { %v3206_v14 = vpop.f32.mrb[32].mxu0  ;;  %1200 = vadd.xlane.f32.xlu0 %v1163_v9  ;;  %v1162_v16 = vmul.f32 %v3404_v10, %v4174_v7  ;;  %3419 = vtanh.f32 %v1031_v25 }
 0x2cf   :  { %v3406_v17 = vpop.eup %3405  ;;  %v1040_v19 = vpop.f32.mrb[33].mxu0  ;;  %1206 = vadd.xlane.f32.xlu1 %v1166_v12  ;;  %v1046_v41 = vadd.f32 %v3206_v14, %v4165_v18 }
 0x2d0   :  { %v1169_v26 = vmul.f32 %v3406_v17, %v4174_v7  ;;  %v3408_v28 = vpop.eup %3407  ;;  %v1041_v27 = vadd.f32 %v4165_v18, %v1040_v19 }
 0x2d1   :  { %v3410_v31 = vpop.eup %3409  ;;  %v1165_v43 = vmul.f32 %v3408_v28, %v4174_v7 }
 0x2d2   :  { %v3209_v35 = vpop.f32.mrb[34].mxu0  ;;  %1198 = vadd.xlane.f32.xlu0 %v1162_v16  ;;  %v3412_v45 = vpop.eup %3411  ;;  %v1168_v50 = vmul.f32 %v3410_v31, %v4174_v7 }
 0x2d3   :  { %v1056_v36 = vadd.f32 %v3209_v35, %v4165_v18  ;;  %v1050_v37 = vpop.f32.mrb[35].mxu0  ;;  %1212 = vadd.xlane.f32.xlu1 %v1169_v26  ;;  %v3414_v51 = vpop.eup %3413  ;;  %v1164_v60 = vmul.f32 %v3412_v45, %v4174_v7 }
 0x2d4   :  { %v3416_v1 = vpop.eup %3415  ;;  %v1171_v2 = vmul.f32 %v3414_v51, %v4174_v7  ;;  %v1051_v10 = vadd.f32 %v4165_v18, %v1050_v37 }
 0x2d5   :  { %3421 = vtanh.f32 %v1056_v36  ;;  %v3418_v3 = vpop.eup %3417  ;;  %v1167_v14 = vmul.f32 %v3416_v1, %v4174_v7  ;;  %v1036_v1 = vadd.f32 %v4188_v62, %v4165_v18 }
 0x2d6   :  { %v3212_v53 = vpop.f32.mrb[36].mxu0  ;;  %1204 = vadd.xlane.f32.xlu0 %v1165_v43  ;;  %3423 = vtanh.f32 %v1046_v41  ;;  %v1170_v17 = vmul.f32 %v3418_v3, %v4174_v7 }
 0x2d7   :  { %v1066_v52 = vadd.f32 %v3212_v53, %v4165_v18  ;;  %v1060_v58 = vpop.f32.mrb[37].mxu0  ;;  %1210 = vadd.xlane.f32.xlu1 %v1168_v50 }
 0x2d8   :  { %v1061_v39 = vadd.f32 %v4165_v18, %v1060_v58  ;;  %v3420_v19 = vpop.eup %3419 }
 0x2d9   :  { %3425 = vtanh.f32 %v1066_v52  ;;  %v1172_v36 = vmul.f32 %v3420_v19, %v4174_v7 }
 0x2da   :  { %v3215_v4 = vpop.f32.mrb[38].mxu0  ;;  %1202 = vadd.xlane.f32.xlu0 %v1164_v60  ;;  %3427 = vtanh.f32 %v1061_v39 }
 0x2db   :  { %v1070_v9 = vpop.f32.mrb[39].mxu0  ;;  %1216 = vadd.xlane.f32.xlu1 %v1171_v2  ;;  %3429 = vtanh.f32 %v1041_v27  ;;  %v1076_v45 = vadd.f32 %v3215_v4, %v4165_v18 }
 0x2dc   :  { %v1071_v12 = vadd.f32 %v4165_v18, %v1070_v9 }
 0x2de   :  { %v3218_v25 = vpop.f32.mrb[40].mxu0  ;;  %1208 = vadd.xlane.f32.xlu0 %v1167_v14  ;;  %3431 = vtanh.f32 %v1071_v12 }
 0x2df   :  { %v3422_v16 = vpop.eup %3421  ;;  %v1080_v26 = vpop.f32.mrb[41].mxu0  ;;  %1214 = vadd.xlane.f32.xlu1 %v1170_v17  ;;  %3433 = vtanh.f32 %v1051_v10  ;;  %v1086_v28 = vadd.f32 %v3218_v25, %v4165_v18 }
 0x2e0   :  { %v1081_v31 = vadd.f32 %v4165_v18, %v1080_v26  ;;  %v1177_v35 = vmul.f32 %v3422_v16, %v4174_v7  ;;  %v3424_v37 = vpop.eup %3423 }
 0x2e1   :  { %v1175_v27 = vmul.f32 %v3424_v37, %v4174_v7 }
 0x2e2   :  { %1228 = vadd.xlane.f32.xlu0 %v1177_v35  ;;  %v3221_v41 = vpop.f32.mrb[42].mxu0  ;;  %3435 = vtanh.f32 %v1081_v31 }
 0x2e3   :  { %v3426_v43 = vpop.eup %3425  ;;  %1218 = vadd.xlane.f32.xlu1 %v1172_v36  ;;  %v1096_v50 = vadd.f32 %v3221_v41, %v4165_v18  ;;  %v1090_v51 = vpop.f32.mrb[43].mxu0  ;;  %3437 = vtanh.f32 %v1086_v28 }
 0x2e4   :  { %v1179_v53 = vmul.f32 %v3426_v43, %v4174_v7  ;;  %v1091_v52 = vadd.f32 %v4165_v18, %v1090_v51  ;;  %v3428_v58 = vpop.eup %3427 }
 0x2e5   :  { %v3430_v39 = vpop.eup %3429  ;;  %3439 = vtanh.f32 %v1096_v50  ;;  %v1178_v4 = vmul.f32 %v3428_v58, %v4174_v7 }
 0x2e6   :  { %1232 = vadd.xlane.f32.xlu0 %v1179_v53  ;;  %v3224_v60 = vpop.f32.mrb[44].mxu0  ;;  %3441 = vtanh.f32 %v1076_v45  ;;  %v1174_v12 = vmul.f32 %v3430_v39, %v4174_v7 }
 0x2e7   :  { %1224 = vadd.xlane.f32.xlu1 %v1175_v27  ;;  %v1106_v2 = vadd.f32 %v3224_v60, %v4165_v18  ;;  %v1100_v3 = vpop.f32.mrb[45].mxu0  ;;  %3443 = vtanh.f32 %v1091_v52 }
 0x2e8   :  { %v1101_v9 = vadd.f32 %v4165_v18, %v1100_v3  ;;  %v3432_v10 = vpop.eup %3431 }
 0x2e9   :  { %3445 = vtanh.f32 %v1106_v2  ;;  %v3434_v14 = vpop.eup %3433  ;;  %v1180_v25 = vmul.f32 %v3432_v10, %v4174_v7 }
 0x2ea   :  { %1230 = vadd.xlane.f32.xlu0 %v1178_v4  ;;  %3447 = vtanh.f32 %v1101_v9  ;;  %v3227_v17 = vpop.f32.mrb[46].mxu0  ;;  %v1176_v28 = vmul.f32 %v3434_v14, %v4174_v7 }
 0x2eb   :  { %3449 = vtanh.f32 %v1036_v1  ;;  %1222 = vadd.xlane.f32.xlu1 %v1174_v12  ;;  %v1116_v62 = vadd.f32 %v3227_v17, %v4165_v18  ;;  %v1110_v19 = vpop.f32.mrb[47].mxu0  ;;  %v1319_v12 = vlaneseq }
 0x2ec   :  { %v1111_v16 = vadd.f32 %v4165_v18, %v1110_v19  ;;  %v3436_v26 = vpop.eup %3435  ;;  %v4241_v19 = vstv %s2828_s8 }
 0x2ed   :  { %3451 = vtanh.f32 %v1116_v62  ;;  %v3438_v31 = vpop.eup %3437  ;;  %v1182_v36 = vmul.f32 %v3436_v26, %v4174_v7  ;;  %v1320_v17 = vand.u32 127, %v1319_v12  ;;  %v4239_v62 = vshrl.u32 %v1319_v12, 7 }
 0x2ee   :  { %1234 = vadd.xlane.f32.xlu0 %v1180_v25  ;;  %3453 = vtanh.f32 %v1111_v16  ;;  %v1183_v41 = vmul.f32 %v3438_v31, %v4174_v7 }
 0x2ef   :  { %1226 = vadd.xlane.f32.xlu1 %v1176_v28  ;;  %v3440_v35 = vpop.eup %3439  ;;  %v4250_v28 = vsub.s32 %v1320_v17, %v4239_v62  ;;  %v4461_v22 = vsub.s32 5, %v4239_v62 }
 0x2f0   :  { %v3442_v37 = vpop.eup %3441  ;;  %v1185_v18 = vmul.f32 %v3440_v35, %v4174_v7 }
 0x2f1   :  { %v3444_v43 = vpop.eup %3443  ;;  %v1181_v51 = vmul.f32 %v3442_v37, %v4174_v7 }
 0x2f2   :  { %1238 = vadd.xlane.f32.xlu0 %v1182_v36  ;;  %v1184_v39 = vmul.f32 %v3444_v43, %v4174_v7 }
 0x2f3   :  { %v3446_v45 = vpop.eup %3445  ;;  %1240 = vadd.xlane.f32.xlu1 %v1183_v41 }
 0x2f4   :  { %v3448_v50 = vpop.eup %3447  ;;  %v1187_v53 = vmul.f32 %v3446_v45, %v4174_v7 }
 0x2f5   :  { %v3450_v52 = vpop.eup %3449  ;;  %v1186_v58 = vmul.f32 %v3448_v50, %v4174_v7 }
 0x2f6   :  { %1236 = vadd.xlane.f32.xlu0 %v1181_v51  ;;  %v1173_v1 = vmul.f32 %v3450_v52, %v4174_v7 }
 0x2f7   :  { %v3452_v27 = vpop.eup %3451  ;;  %1244 = vadd.xlane.f32.xlu1 %v1185_v18 }
 0x2f8   :  { %v3454_v60 = vpop.eup %3453  ;;  %v1189_v2 = vmul.f32 %v3452_v27, %v4174_v7 }
 0x2f9   :  { %v1188_v3 = vmul.f32 %v3454_v60, %v4174_v7 }
 0x2fa   :  { %1220 = vadd.xlane.f32.xlu0 %v1173_v1 }
 0x2fb   :  { %1242 = vadd.xlane.f32.xlu1 %v1184_v39 }
 0x2ff   :  { %1248 = vadd.xlane.f32.xlu1 %v1187_v53 }
 0x303   :  { %1246 = vadd.xlane.f32.xlu1 %v1186_v58 }
 0x307   :  { %1250 = vadd.xlane.f32.xlu1 %v1188_v3 }
 0x30b   :  { %1252 = vadd.xlane.f32.xlu1 %v1189_v2 }
 0x34b   :  { %v1193_v4 = vpop.xlane.xlu0 %1192 }
 0x34c   :  { %v4253_v31 = vadd.f32 %v4241_v19, %v1193_v4 }
 0x34e   :  { %v1328_v45 = vrot.slane %v4253_v31, %v4250_v28 }
 0x34f   :  { %v1191_v9 = vpop.xlane.xlu0 %1190 }
 0x350   :  { %v4244_v25 = vadd.f32 %v4241_v19, %v1191_v9 }
 0x352   :  { %v1324_v35 = vrot.slane %v4244_v25, %v4250_v28 }
 0x353   :  { %v1197_v10 = vpop.xlane.xlu0 %1196 }
 0x354   :  { %v4265_v18 = vadd.f32 %v4241_v19, %v1197_v10  ;;  %v1450_v50 = vsel %vm1449_vm1, %v1328_v45, %v1324_v35 }
 0x356   :  { %v1336_v27 = vrot.slane %v4265_v18, %v4250_v28 }
 0x357   :  { %v1195_v14 = vpop.xlane.xlu0 %1194 }
 0x358   :  { %v4247_v16 = vadd.f32 %v4241_v19, %v1195_v14 }
 0x35a   :  { %v1332_v37 = vrot.slane %v4247_v16, %v4250_v28 }
 0x35b   :  { %v1201_v7 = vpop.xlane.xlu0 %1200 }
 0x35c   :  { %v1207_v26 = vpop.xlane.xlu1 %1206  ;;  %v1452_v53 = vsel %vm1451_vm2, %v1332_v37, %v1450_v50  ;;  %v4274_v39 = vadd.f32 %v4241_v19, %v1201_v7 }
 0x35d   :  { %v1454_v60 = vsel %vm1453_vm3, %v1336_v27, %v1452_v53 }
 0x35e   :  { %v1344_v10 = vrot.slane %v4274_v39, %v4250_v28 }
 0x35f   :  { %v1199_v36 = vpop.xlane.xlu0 %1198 }
 0x360   :  { %v4260_v41 = vadd.f32 %v4241_v19, %v1199_v36  ;;  %v1213_v43 = vpop.xlane.xlu1 %1212 }
 0x362   :  { %v1340_v52 = vrot.slane %v4260_v41, %v4250_v28 }
 0x363   :  { %v1205_v51 = vpop.xlane.xlu0 %1204 }
 0x364   :  { %v1211_v58 = vpop.xlane.xlu1 %1210  ;;  %v4278_v1 = vadd.f32 %v4241_v19, %v1205_v51  ;;  %v1456_v3 = vsel %vm1455_vm4, %v1340_v52, %v1454_v60  ;;  %v4298_v60 = vadd.f32 %v4241_v19, %v1207_v26  ;;  %v4314_v26 = vadd.f32 %v4241_v19, %v1213_v43 }
 0x365   :  { %v1458_v7 = vsel %vm1457_vm5, %v1344_v10, %v1456_v3 }
 0x366   :  { %v1352_v14 = vrot.slane %v4278_v1, %v4250_v28 }
 0x367   :  { %v1203_v2 = vpop.xlane.xlu0 %1202 }
 0x368   :  { %v4282_v4 = vadd.f32 %v4241_v19, %v1203_v2  ;;  %v1217_v9 = vpop.xlane.xlu1 %1216 }
 0x36a   :  { %v1348_v12 = vrot.slane %v4282_v4, %v4250_v28 }
 0x36b   :  { %v1209_v17 = vpop.xlane.xlu0 %1208 }
 0x36c   :  { %v1215_v35 = vpop.xlane.xlu1 %1214  ;;  %v1460_v36 = vsel %vm1459_vm6, %v1348_v12, %v1458_v7  ;;  %v4295_v52 = vadd.f32 %v4241_v19, %v1209_v17  ;;  %v4303_v12 = vadd.f32 %v4241_v19, %v1211_v58  ;;  %v1356_v7 = vrot.slane %v4298_v60, %v4250_v28 }
 0x36d   :  { %v1462_v37 = vsel %vm1461_vm7, %v1352_v14, %v1460_v36 }
 0x36e   :  { %v1489_v45 = vsel %vm1488_vm8, %v1462_v37, -inf  ;;  %v1360_v3 = vrot.slane %v4295_v52, %v4250_v28  ;;  %v1364_v54 = vrot.slane %v4303_v12, %v4250_v28 }
 0x36f   :  { %1490 = vmax.xlane.f32.xlu0 %v1489_v45  ;;  %v1229_v50 = vpop.xlane.xlu0 %1228 }
 0x370   :  { %v1219_v51 = vpop.xlane.xlu1 %1218  ;;  %v1463_v37 = vsel %vm1449_vm1, %v1360_v3, %v1356_v7  ;;  %v4318_v45 = vadd.f32 %v4241_v19, %v1229_v50  ;;  %v4337_v7 = vadd.f32 %v4241_v19, %v1215_v35 }
 0x371   :  { %v1464_v3 = vsel %vm1451_vm2, %v1364_v54, %v1463_v37  ;;  %v4353_v37 = vadd.f32 %v4241_v19, %v1217_v9 }
 0x373   :  { %v1233_v53 = vpop.xlane.xlu0 %1232 }
 0x374   :  { %v1225_v27 = vpop.xlane.xlu1 %1224  ;;  %v4331_v43 = vadd.f32 %v4241_v19, %v1233_v53 }
 0x375   :  { %v4311_v17 = vadd.f32 %v4241_v19, %v1225_v27 }
 0x376   :  { %v1408_v23 = vrot.slane %v4331_v43, %v4250_v28 }
 0x377   :  { %v1231_v2 = vpop.xlane.xlu0 %1230  ;;  %v1392_v50 = vrot.slane %v4311_v17, %v4250_v28 }
 0x378   :  { %v1223_v10 = vpop.xlane.xlu1 %1222  ;;  %v4325_v57 = vadd.f32 %v4241_v19, %v1231_v2  ;;  %v1368_v2 = vrot.slane %v4314_v26, %v4250_v28 }
 0x379   :  { %v4306_v14 = vadd.f32 %v4241_v19, %v1223_v10 }
 0x37a   :  { %v1404_v15 = vrot.slane %v4325_v57, %v4250_v28  ;;  %v1465_v34 = vsel %vm1453_vm3, %v1368_v2, %v1464_v3  ;;  %v1376_v2 = vrot.slane %v4353_v37, %v4250_v28 }
 0x37b   :  { %v1235_v36 = vpop.xlane.xlu0 %1234  ;;  %v1388_v58 = vrot.slane %v4306_v14, %v4250_v28 }
 0x37c   :  { %v1227_v10 = vpop.xlane.xlu1 %1226  ;;  %v4349_v54 = vadd.f32 %v4241_v19, %v1235_v36 }
 0x37d   :  { %v4328_v27 = vadd.f32 %v4241_v19, %v1227_v10  ;;  %v1400_v10 = vrot.slane %v4318_v45, %v4250_v28  ;;  %v1470_v53 = vsel %vm1449_vm1, %v1392_v50, %v1388_v58  ;;  %v1372_v58 = vrot.slane %v4337_v7, %v4250_v28 }
 0x37e   :  { %v4362_v50 = vadd.f32 %v4241_v19, %v1219_v51 }
 0x37f   :  { %v1396_v46 = vrot.slane %v4328_v27, %v4250_v28  ;;  %v1239_v47 = vpop.xlane.xlu0 %1238  ;;  %v1466_v3 = vsel %vm1455_vm4, %v1372_v58, %v1465_v34 }
 0x380   :  { %v1241_v30 = vpop.xlane.xlu1 %1240  ;;  %v1467_v34 = vsel %vm1457_vm5, %v1376_v2, %v1466_v3  ;;  %v4388_v32 = vadd.f32 %v4241_v19, %v1239_v47 }
 0x381   :  { %v1471_v35 = vsel %vm1451_vm2, %v1396_v46, %v1470_v53  ;;  %v4391_v8 = vadd.f32 %v4241_v19, %v1241_v30 }
 0x382   :  { %v1472_v20 = vsel %vm1453_vm3, %v1400_v10, %v1471_v35  ;;  %v1412_v10 = vrot.slane %v4349_v54, %v4250_v28  ;;  %v1420_v47 = vrot.slane %v4388_v32, %v4250_v28 }
 0x383   :  { %v1237_v36 = vpop.xlane.xlu0 %1236  ;;  %v1473_v42 = vsel %vm1455_vm4, %v1404_v15, %v1472_v20  ;;  %v1380_v15 = vrot.slane %v4362_v50, %v4250_v28  ;;  %v1424_v30 = vrot.slane %v4391_v8, %v4250_v28 }
 0x384   :  { %v4366_v46 = vadd.f32 %v4241_v19, %v1237_v36  ;;  %v1245_v9 = vpop.xlane.xlu1 %1244  ;;  %v1474_v53 = vsel %vm1457_vm5, %v1408_v23, %v1473_v42 }
 0x385   :  { %v1475_v35 = vsel %vm1459_vm6, %v1412_v10, %v1474_v53  ;;  %v1468_v53 = vsel %vm1459_vm6, %v1380_v15, %v1467_v34  ;;  %v3567_v10 = vmov 0   ;;  %v4404_v15 = vadd.f32 %v4241_v19, %v1245_v9 }
 0x386   :  { %v1416_v51 = vrot.slane %v4366_v46, %v4250_v28  ;;  %3390 = vset.pattern.permute.xlu1 %v3567_v10  ;;  %3389 = vset.pattern.permute.xlu0 %v3567_v10 }
 0x387   :  { %v1221_v20 = vpop.xlane.xlu0 %1220  ;;  %v1432_v34 = vrot.slane %v4404_v15, %v4250_v28 }
 0x388   :  { %v4380_v36 = vadd.f32 %v4241_v19, %v1221_v20  ;;  %v1243_v42 = vpop.xlane.xlu1 %1242  ;;  %v1476_v23 = vsel %vm1461_vm7, %v1416_v51, %v1475_v35 }
 0x389   :  { %v1495_v58 = vsel %vm1488_vm8, %v1476_v23, -inf  ;;  %v4395_v51 = vadd.f32 %v4241_v19, %v1243_v42 }
 0x38a   :  { %v1384_v5 = vrot.slane %v4380_v36, %v4250_v28  ;;  %1496 = vmax.xlane.f32.xlu1 %v1495_v58 }
 0x38b   :  { %v1428_v35 = vrot.slane %v4395_v51, %v4250_v28 }
 0x38c   :  { %v1249_v3 = vpop.xlane.xlu1 %1248  ;;  %v1469_v2 = vsel %vm1461_vm7, %v1384_v5, %v1468_v53  ;;  %v1477_v5 = vsel %vm1449_vm1, %v1424_v30, %v1420_v47 }
 0x38d   :  { %v1492_v20 = vsel %vm1488_vm8, %v1469_v2, -inf  ;;  %v4415_v58 = vadd.f32 %v4241_v19, %v1249_v3  ;;  %v1478_v53 = vsel %vm1451_vm2, %v1428_v35, %v1477_v5 }
 0x38e   :  { %1493 = vmax.xlane.f32.xlu0 %v1492_v20  ;;  %v1479_v47 = vsel %vm1453_vm3, %v1432_v34, %v1478_v53  ;;  %v4439_v53 = vsub.s32 0, %v4239_v62 }
 0x38f   :  { %v1440_v20 = vrot.slane %v4415_v58, %v4250_v28 }
 0x390   :  { %v1247_v42 = vpop.xlane.xlu1 %1246 }
 0x391   :  { %v4409_v23 = vadd.f32 %v4241_v19, %v1247_v42 }
 0x393   :  { %v1436_v9 = vrot.slane %v4409_v23, %v4250_v28 }
 0x394   :  { %v1251_v10 = vpop.xlane.xlu1 %1250 }
 0x395   :  { %v4421_v2 = vadd.f32 %v4241_v19, %v1251_v10  ;;  %v1480_v30 = vsel %vm1455_vm4, %v1436_v9, %v1479_v47  ;;  %v4442_v9 = vsub.s32 1, %v4239_v62  ;;  %v4448_v47 = vsub.s32 3, %v4239_v62 }
 0x396   :  { %v1481_v10 = vsel %vm1457_vm5, %v1440_v20, %v1480_v30 }
 0x397   :  { %v1444_v3 = vrot.slane %v4421_v2, %v4250_v28 }
 0x398   :  { %v1253_v42 = vpop.xlane.xlu1 %1252 }
 0x399   :  { %v4430_v35 = vadd.f32 %v4241_v19, %v1253_v42  ;;  %v1482_v33 = vsel %vm1459_vm6, %v1444_v3, %v1481_v10  ;;  %v4445_v19 = vsub.s32 2, %v4239_v62 }
 0x39b   :  { %v1448_v5 = vrot.slane %v4430_v35, %v4250_v28 }
 0x39d   :  { %v1483_v0 = vsel %vm1461_vm7, %v1448_v5, %v1482_v33  ;;  %v4456_v5 = vsub.s32 4, %v4239_v62 }
 0x39e   :  { %v1498_v34 = vsel %vm1488_vm8, %v1483_v0, -inf }
 0x39f   :  { %1499 = vmax.xlane.f32.xlu1 %v1498_v34 }
 0x3fc   :  { %v1491_v20 = vpop.xlane.xlu0 %1490 }
 0x3fd   :  { %v1508_v30 = vrot.slane %v1491_v20, %v4439_v53  ;;  %v1512_v33 = vrot.slane %v1491_v20, %v4442_v9  ;;  %v1516_v0 = vrot.slane %v1491_v20, %v4445_v19  ;;  %v1520_v10 = vrot.slane %v1491_v20, %v4448_v47 }
 0x3fe   :  { %v1524_v13 = vrot.slane %v1491_v20, %v4456_v5 }
 0x3ff   :  { %v1665_v3 = vsub.f32 %v4244_v25, %v1508_v30  ;;  %v1666_v42 = vsub.f32 %v4253_v31, %v1512_v33  ;;  %v1667_v34 = vsub.f32 %v4247_v16, %v1516_v0  ;;  %v1668_v55 = vsub.f32 %v4265_v18, %v1520_v10 }
 0x400   :  { %v4466_v31 = vsub.s32 6, %v4239_v62  ;;  %v1528_v30 = vrot.slane %v1491_v20, %v4461_v22  ;;  %v1669_v33 = vsub.f32 %v4260_v41, %v1524_v13  ;;  %v4471_v0 = vsub.s32 7, %v4239_v62 }
 0x401   :  { %v1697_v61 = vmul.f32 1.442695, %v1665_v3  ;;  %v1699_v24 = vmul.f32 1.442695, %v1666_v42  ;;  %v1701_v25 = vmul.f32 1.442695, %v1667_v34 }
 0x402   :  { %v1703_v16 = vmul.f32 1.442695, %v1668_v55  ;;  %v1670_v3 = vsub.f32 %v4274_v39, %v1528_v30  ;;  %v1705_v18 = vmul.f32 1.442695, %v1669_v33  ;;  %v1536_v13 = vrot.slane %v1491_v20, %v4471_v0 }
 0x403   :  { %3455 = vpow2.f32 %v1697_v61  ;;  %v1532_v61 = vrot.slane %v1491_v20, %v4466_v31 }
 0x404   :  { %3457 = vpow2.f32 %v1699_v24  ;;  %v1707_v62 = vmul.f32 1.442695, %v1670_v3  ;;  %v1672_v39 = vsub.f32 %v4278_v1, %v1536_v13 }
 0x405   :  { %3459 = vpow2.f32 %v1701_v25  ;;  %v1671_v55 = vsub.f32 %v4282_v4, %v1532_v61 }
 0x406   :  { %3461 = vpow2.f32 %v1703_v16  ;;  %v1711_v25 = vmul.f32 1.442695, %v1672_v39 }
 0x407   :  { %3463 = vpow2.f32 %v1705_v18  ;;  %v1709_v10 = vmul.f32 1.442695, %v1671_v55 }
 0x408   :  { %3465 = vpow2.f32 %v1707_v62 }
 0x409   :  { %3467 = vpow2.f32 %v1709_v10 }
 0x40a   :  { %3469 = vpow2.f32 %v1711_v25 }
 0x40d   :  { %v4475_v24 = vpop.eup %3455 }
 0x40e   :  { %v4477_v42 = vpop.eup %3457  ;;  %1794 = vperm.xlu0 %3389, %v4475_v24  }
 0x40f   :  { %1797 = vperm.xlu1 %3390, %v4477_v42   ;;  %v4483_v41 = vpop.eup %3459 }
 0x410   :  { %v4487_v34 = vpop.eup %3461 }
 0x411   :  { %v4490_v30 = vpop.eup %3463 }
 0x412   :  { %v4497_v33 = vpop.eup %3465 }
 0x413   :  { %1800 = vperm.xlu1 %3390, %v4483_v41   ;;  %v4510_v55 = vpop.eup %3467 }
 0x414   :  { %v4519_v59 = vpop.eup %3469 }
 0x417   :  { %1803 = vperm.xlu1 %3390, %v4487_v34   ;;  %v4503_v61 = vpop.xlane.xlu1 %1496 }
 0x418   :  { %v1572_v62 = vrot.slane %v4503_v61, %v4439_v53 }
 0x41b   :  { %1806 = vperm.xlu1 %3390, %v4490_v30   ;;  %v4493_v4 = vpop.xlane.xlu0 %1493 }
 0x41c   :  { %v1540_v20 = vrot.slane %v4493_v4, %v4439_v53  ;;  %v1544_v1 = vrot.slane %v4493_v4, %v4442_v9  ;;  %v1548_v16 = vrot.slane %v4493_v4, %v4445_v19  ;;  %v1552_v3 = vrot.slane %v4493_v4, %v4448_v47 }
 0x41d   :  { %v1556_v25 = vrot.slane %v4493_v4, %v4456_v5 }
 0x41e   :  { %v1673_v18 = vsub.f32 %v4298_v60, %v1540_v20  ;;  %v1675_v13 = vsub.f32 %v4303_v12, %v1548_v16  ;;  %v1674_v39 = vsub.f32 %v4295_v52, %v1544_v1  ;;  %v1676_v11 = vsub.f32 %v4314_v26, %v1552_v3 }
 0x41f   :  { %1809 = vperm.xlu1 %3390, %v4497_v33   ;;  %v1576_v60 = vrot.slane %v4503_v61, %v4442_v9  ;;  %v1681_v12 = vsub.f32 %v4306_v14, %v1572_v62  ;;  %v1560_v52 = vrot.slane %v4493_v4, %v4461_v22  ;;  %v1677_v1 = vsub.f32 %v4337_v7, %v1556_v25 }
 0x420   :  { %v1713_v10 = vmul.f32 1.442695, %v1673_v18  ;;  %v1717_v44 = vmul.f32 1.442695, %v1675_v13  ;;  %v1715_v20 = vmul.f32 1.442695, %v1674_v39  ;;  %v1580_v26 = vrot.slane %v4503_v61, %v4445_v19 }
 0x421   :  { %v1719_v16 = vmul.f32 1.442695, %v1676_v11  ;;  %v1682_v3 = vsub.f32 %v4311_v17, %v1576_v60  ;;  %v1729_v18 = vmul.f32 1.442695, %v1681_v12  ;;  %v1564_v14 = vrot.slane %v4493_v4, %v4466_v31 }
 0x422   :  { %3471 = vpow2.f32 %v1713_v10  ;;  %v1678_v13 = vsub.f32 %v4353_v37, %v1560_v52  ;;  %v1721_v62 = vmul.f32 1.442695, %v1677_v1  ;;  %v1683_v11 = vsub.f32 %v4328_v27, %v1580_v26 }
 0x423   :  { %1812 = vperm.xlu1 %3390, %v4510_v55   ;;  %3473 = vpow2.f32 %v1717_v44  ;;  %v1584_v44 = vrot.slane %v4503_v61, %v4448_v47  ;;  %v1731_v7 = vmul.f32 1.442695, %v1682_v3  ;;  %v1679_v17 = vsub.f32 %v4362_v50, %v1564_v14 }
 0x424   :  { %3475 = vpow2.f32 %v1715_v20  ;;  %v1723_v25 = vmul.f32 1.442695, %v1678_v13  ;;  %v1588_v12 = vrot.slane %v4503_v61, %v4456_v5  ;;  %v1733_v20 = vmul.f32 1.442695, %v1683_v11 }
 0x425   :  { %3477 = vpow2.f32 %v1719_v16  ;;  %v1684_v27 = vsub.f32 %v4318_v45, %v1584_v44  ;;  %v1725_v50 = vmul.f32 1.442695, %v1679_v17  ;;  %v1592_v45 = vrot.slane %v4503_v61, %v4461_v22 }
 0x426   :  { %3479 = vpow2.f32 %v1729_v18  ;;  %v1685_v3 = vsub.f32 %v4325_v57, %v1588_v12  ;;  %v1596_v57 = vrot.slane %v4503_v61, %v4466_v31 }
 0x427   :  { %1815 = vperm.xlu1 %3390, %v4519_v59   ;;  %3481 = vpow2.f32 %v1721_v62  ;;  %v1735_v18 = vmul.f32 1.442695, %v1684_v27  ;;  %v1686_v11 = vsub.f32 %v4331_v43, %v1592_v45 }
 0x428   :  { %3483 = vpow2.f32 %v1731_v7  ;;  %v1737_v7 = vmul.f32 1.442695, %v1685_v3  ;;  %v1687_v27 = vsub.f32 %v4349_v54, %v1596_v57  ;;  %v1600_v54 = vrot.slane %v4503_v61, %v4471_v0 }
 0x429   :  { %3485 = vpow2.f32 %v1723_v25  ;;  %v1739_v43 = vmul.f32 1.442695, %v1686_v11 }
 0x42a   :  { %3487 = vpow2.f32 %v1733_v20  ;;  %v1741_v3 = vmul.f32 1.442695, %v1687_v27  ;;  %v1688_v61 = vsub.f32 %v4366_v46, %v1600_v54 }
 0x42b   :  { %3489 = vpow2.f32 %v1725_v50 }
 0x42c   :  { %v4534_v39 = vpop.xlane.xlu1 %1499  ;;  %v4539_v10 = vpop.eup %3471  ;;  %3491 = vpow2.f32 %v1735_v18  ;;  %v1743_v46 = vmul.f32 1.442695, %v1688_v61 }
 0x42d   :  { %v1608_v37 = vrot.slane %v4534_v39, %v4442_v9  ;;  %1818 = vperm.xlu1 %3390, %v4539_v10   ;;  %v4545_v60 = vpop.eup %3473  ;;  %v1612_v1 = vrot.slane %v4534_v39, %v4445_v19  ;;  %v1616_v13 = vrot.slane %v4534_v39, %v4448_v47  ;;  %v1620_v25 = vrot.slane %v4534_v39, %v4456_v5 }
 0x42e   :  { %1824 = vperm.xlu0 %3389, %v4545_v60   ;;  %v4551_v52 = vpop.eup %3475  ;;  %v1604_v20 = vrot.slane %v4534_v39, %v4439_v53 }
 0x42f   :  { %v1690_v16 = vsub.f32 %v4391_v8, %v1608_v37  ;;  %v4557_v26 = vpop.eup %3477  ;;  %v1691_v8 = vsub.f32 %v4395_v51, %v1612_v1  ;;  %v1692_v51 = vsub.f32 %v4404_v15, %v1616_v13  ;;  %v1624_v15 = vrot.slane %v4534_v39, %v4461_v22 }
 0x430   :  { %v4563_v14 = vpop.eup %3479  ;;  %v1693_v1 = vsub.f32 %v4409_v23, %v1620_v25  ;;  %v1689_v18 = vsub.f32 %v4388_v32, %v1604_v20  ;;  %v1628_v23 = vrot.slane %v4534_v39, %v4466_v31  ;;  %v1568_v32 = vrot.slane %v4493_v4, %v4471_v0 }
 0x431   :  { %1821 = vperm.xlu1 %3390, %v4551_v52   ;;  %v1747_v62 = vmul.f32 1.442695, %v1690_v16  ;;  %v4569_v44 = vpop.eup %3481  ;;  %v1749_v37 = vmul.f32 1.442695, %v1691_v8  ;;  %v1751_v16 = vmul.f32 1.442695, %v1692_v51  ;;  %v1694_v8 = vsub.f32 %v4415_v58, %v1624_v15 }
 0x432   :  { %1827 = vperm.xlu0 %3389, %v4557_v26   ;;  %v4575_v17 = vpop.eup %3483  ;;  %v1745_v11 = vmul.f32 1.442695, %v1689_v18  ;;  %v1632_v58 = vrot.slane %v4534_v39, %v4471_v0  ;;  %v1695_v25 = vsub.f32 %v4421_v2, %v1628_v23  ;;  %v1680_v27 = vsub.f32 %v4380_v36, %v1568_v32 }
 0x433   :  { %3493 = vpow2.f32 %v1747_v62  ;;  %v4581_v12 = vpop.eup %3485  ;;  %v1753_v62 = vmul.f32 1.442695, %v1693_v1  ;;  %v1755_v51 = vmul.f32 1.442695, %v1694_v8 }
 0x434   :  { %3495 = vpow2.f32 %v1737_v7  ;;  %v4587_v50 = vpop.eup %3487  ;;  %v1757_v39 = vmul.f32 1.442695, %v1695_v25  ;;  %v1727_v20 = vmul.f32 1.442695, %v1680_v27 }
 0x435   :  { %1842 = vperm.xlu1 %3390, %v4563_v14   ;;  %3497 = vpow2.f32 %v1749_v37  ;;  %v4593_v45 = vpop.eup %3489 }
 0x436   :  { %1830 = vperm.xlu0 %3389, %v4569_v44   ;;  %3499 = vpow2.f32 %v1739_v43  ;;  %v4599_v13 = vpop.eup %3491  ;;  %v1696_v43 = vsub.f32 %v4430_v35, %v1632_v58 }
 0x437   :  { %3501 = vpow2.f32 %v1751_v16 }
 0x438   :  { %3503 = vpow2.f32 %v1741_v3  ;;  %v1759_v36 = vmul.f32 1.442695, %v1696_v43 }
 0x439   :  { %1845 = vperm.xlu1 %3390, %v4575_v17   ;;  %3505 = vpow2.f32 %v1753_v62 }
 0x43a   :  { %1833 = vperm.xlu0 %3389, %v4581_v12   ;;  %3507 = vpow2.f32 %v1745_v11 }
 0x43b   :  { %3509 = vpow2.f32 %v1755_v51 }
 0x43c   :  { %3511 = vpow2.f32 %v1743_v46 }
 0x43d   :  { %1848 = vperm.xlu1 %3390, %v4587_v50   ;;  %v4605_v57 = vpop.eup %3493  ;;  %3513 = vpow2.f32 %v1757_v39 }
 0x43e   :  { %1836 = vperm.xlu0 %3389, %v4593_v45   ;;  %v4611_v7 = vpop.eup %3495  ;;  %3515 = vpow2.f32 %v1727_v20 }
 0x43f   :  { %v4617_v37 = vpop.eup %3497  ;;  %3517 = vpow2.f32 %v1759_v36 }
 0x440   :  { %v4621_v4 = vpop.eup %3499 }
 0x441   :  { %1851 = vperm.xlu1 %3390, %v4599_v13   ;;  %v4625_v2 = vpop.eup %3501 }
 0x442   :  { %1869 = vperm.xlu0 %3389, %v4605_v57   ;;  %5004 = vst [vmem:[#allocation40_spill] sm:$0xff] %v4625_v2  ;;  %v4628_v15 = vpop.eup %3503 }
 0x443   :  { %v4631_v1 = vpop.eup %3505 }
 0x444   :  { %5005 = vst [vmem:[#allocation41_spill] sm:$0xff] %v4631_v1  ;;  %v4634_v35 = vpop.eup %3507 }
 0x445   :  { %1854 = vperm.xlu1 %3390, %v4611_v7   ;;  %v4637_v16 = vpop.eup %3509 }
 0x446   :  { %1872 = vperm.xlu0 %3389, %v4617_v37   ;;  %5006 = vst [vmem:[#allocation42_spill] sm:$0xff] %v4637_v16  ;;  %v4640_v54 = vpop.eup %3511 }
 0x447   :  { %v4643_v3 = vpop.eup %3513 }
 0x448   :  { %5007 = vst [vmem:[#allocation43_spill] sm:$0xff] %v4643_v3  ;;  %v4646_v18 = vpop.eup %3515 }
 0x449   :  { %1857 = vperm.xlu1 %3390, %v4621_v4   ;;  %v4649_v23 = vpop.eup %3517 }
 0x44a   :  { %1875 = vperm.xlu0 %3389, %v4625_v2   ;;  %5008 = vst [vmem:[#allocation44_spill] sm:$0xff] %v4649_v23 }
 0x44d   :  { %1860 = vperm.xlu1 %3390, %v4628_v15  }
 0x44e   :  { %1878 = vperm.xlu0 %3389, %v4631_v1  }
 0x451   :  { %1866 = vperm.xlu1 %3390, %v4634_v35  }
 0x452   :  { %1881 = vperm.xlu0 %3389, %v4637_v16  }
 0x455   :  { %1863 = vperm.xlu1 %3390, %v4640_v54  }
 0x456   :  { %1884 = vperm.xlu0 %3389, %v4643_v3  }
 0x459   :  { %1839 = vperm.xlu1 %3390, %v4646_v18  }
 0x45a   :  { %1887 = vperm.xlu0 %3389, %v4649_v23  }
 0x48d   :  { %v1795_v11 = vpop.permute.xlu0 %1794 }
 0x48e   :  { %v1798_v8 = vpop.permute.xlu1 %1797  ;;  %v1892_v51 = vrot.slane %v1795_v11, %v4250_v28 }
 0x48f   :  { %v1896_v25 = vrot.slane %v1798_v8, %v4250_v28 }
 0x491   :  { %v2017_v20 = vsel %vm1449_vm1, %v1896_v25, %v1892_v51 }
 0x492   :  { %v1801_v62 = vpop.permute.xlu1 %1800 }
 0x493   :  { %v1900_v46 = vrot.slane %v1801_v62, %v4250_v28 }
 0x495   :  { %v2018_v6 = vsel %vm1451_vm2, %v1900_v46, %v2017_v20 }
 0x496   :  { %v1804_v61 = vpop.permute.xlu1 %1803 }
 0x497   :  { %v1904_v27 = vrot.slane %v1804_v61, %v4250_v28 }
 0x499   :  { %v2019_v49 = vsel %vm1453_vm3, %v1904_v27, %v2018_v6 }
 0x49a   :  { %v1807_v32 = vpop.permute.xlu1 %1806 }
 0x49b   :  { %v1908_v43 = vrot.slane %v1807_v32, %v4250_v28 }
 0x49d   :  { %v2020_v8 = vsel %vm1455_vm4, %v1908_v43, %v2019_v49 }
 0x49e   :  { %v1810_v58 = vpop.permute.xlu1 %1809 }
 0x49f   :  { %v1912_v36 = vrot.slane %v1810_v58, %v4250_v28 }
 0x4a1   :  { %v2021_v62 = vsel %vm1457_vm5, %v1912_v36, %v2020_v8 }
 0x4a2   :  { %v1813_v39 = vpop.permute.xlu1 %1812 }
 0x4a3   :  { %v1916_v63 = vrot.slane %v1813_v39, %v4250_v28 }
 0x4a5   :  { %v2022_v32 = vsel %vm1459_vm6, %v1916_v63, %v2021_v62 }
 0x4a6   :  { %v1816_v11 = vpop.permute.xlu1 %1815 }
 0x4a7   :  { %v1920_v61 = vrot.slane %v1816_v11, %v4250_v28 }
 0x4a9   :  { %v2023_v56 = vsel %vm1461_vm7, %v1920_v61, %v2022_v32 }
 0x4aa   :  { %v2049_v25 = vsel %vm1488_vm8, %v2023_v56, 0.0 }
 0x4ab   :  { %2050 = vadd.xlane.f32.xlu1 %v2049_v25 }
 0x4ac   :  { %v1819_v58 = vpop.permute.xlu1 %1818 }
 0x4ad   :  { %v1825_v51 = vpop.permute.xlu0 %1824  ;;  %v1924_v56 = vrot.slane %v1819_v58, %v4250_v28 }
 0x4ae   :  { %v1932_v38 = vrot.slane %v1825_v51, %v4250_v28 }
 0x4b0   :  { %v1822_v46 = vpop.permute.xlu1 %1821 }
 0x4b1   :  { %v1828_v39 = vpop.permute.xlu0 %1827  ;;  %v1928_v62 = vrot.slane %v1822_v46, %v4250_v28 }
 0x4b2   :  { %v1936_v46 = vrot.slane %v1828_v39, %v4250_v28 }
 0x4b3   :  { %v2024_v25 = vsel %vm1449_vm1, %v1928_v62, %v1924_v56 }
 0x4b4   :  { %v1843_v20 = vpop.permute.xlu1 %1842  ;;  %v2025_v1 = vsel %vm1451_vm2, %v1932_v38, %v2024_v25 }
 0x4b5   :  { %v1831_v6 = vpop.permute.xlu0 %1830  ;;  %v1956_v3 = vrot.slane %v1843_v20, %v4250_v28  ;;  %v2026_v39 = vsel %vm1453_vm3, %v1936_v46, %v2025_v1 }
 0x4b8   :  { %v1846_v27 = vpop.permute.xlu1 %1845 }
 0x4b9   :  { %v1834_v49 = vpop.permute.xlu0 %1833  ;;  %v1960_v21 = vrot.slane %v1846_v27, %v4250_v28 }
 0x4bb   :  { %v2031_v62 = vsel %vm1449_vm1, %v1960_v21, %v1956_v3  ;;  %v1940_v3 = vrot.slane %v1831_v6, %v4250_v28 }
 0x4bc   :  { %v1849_v43 = vpop.permute.xlu1 %1848 }
 0x4bd   :  { %v1837_v29 = vpop.permute.xlu0 %1836  ;;  %v1964_v40 = vrot.slane %v1849_v43, %v4250_v28 }
 0x4bf   :  { %v2032_v56 = vsel %vm1451_vm2, %v1964_v40, %v2031_v62 }
 0x4c0   :  { %v1852_v36 = vpop.permute.xlu1 %1851 }
 0x4c1   :  { %v1870_v8 = vpop.permute.xlu0 %1869  ;;  %v1968_v16 = vrot.slane %v1852_v36, %v4250_v28 }
 0x4c2   :  { %v1992_v27 = vrot.slane %v1870_v8, %v4250_v28 }
 0x4c4   :  { %v1855_v11 = vpop.permute.xlu1 %1854 }
 0x4c5   :  { %v1873_v48 = vpop.permute.xlu0 %1872  ;;  %v1972_v58 = vrot.slane %v1855_v11, %v4250_v28  ;;  %v2033_v11 = vsel %vm1453_vm3, %v1968_v16, %v2032_v56 }
 0x4c6   :  { %v1996_v20 = vrot.slane %v1873_v48, %v4250_v28 }
 0x4c7   :  { %v2034_v8 = vsel %vm1455_vm4, %v1972_v58, %v2033_v11 }
 0x4c8   :  { %v1858_v63 = vpop.permute.xlu1 %1857 }
 0x4c9   :  { %v1876_v61 = vpop.permute.xlu0 %1875  ;;  %v1976_v51 = vrot.slane %v1858_v63, %v4250_v28  ;;  %v1944_v63 = vrot.slane %v1834_v49, %v4250_v28 }
 0x4ca   :  { %v2000_v25 = vrot.slane %v1876_v61, %v4250_v28  ;;  %v1948_v61 = vrot.slane %v1837_v29, %v4250_v28 }
 0x4cc   :  { %v1861_v32 = vpop.permute.xlu1 %1860 }
 0x4cd   :  { %v1879_v23 = vpop.permute.xlu0 %1878  ;;  %v1980_v36 = vrot.slane %v1861_v32, %v4250_v28  ;;  %v2035_v32 = vsel %vm1457_vm5, %v1976_v51, %v2034_v8 }
 0x4cf   :  { %v2036_v58 = vsel %vm1459_vm6, %v1980_v36, %v2035_v32 }
 0x4d0   :  { %v1867_v2 = vpop.permute.xlu1 %1866 }
 0x4d1   :  { %v1988_v43 = vrot.slane %v1867_v2, %v4250_v28  ;;  %v1882_v38 = vpop.permute.xlu0 %1881  ;;  %v2004_v2 = vrot.slane %v1879_v23, %v4250_v28 }
 0x4d2   :  { %v2008_v23 = vrot.slane %v1882_v38, %v4250_v28 }
 0x4d3   :  { %v2038_v21 = vsel %vm1449_vm1, %v1992_v27, %v1988_v43  ;;  %v2027_v27 = vsel %vm1455_vm4, %v1940_v3, %v2026_v39 }
 0x4d4   :  { %v2039_v40 = vsel %vm1451_vm2, %v1996_v20, %v2038_v21  ;;  %v1864_v48 = vpop.permute.xlu1 %1863  ;;  %v2028_v56 = vsel %vm1457_vm5, %v1944_v63, %v2027_v27 }
 0x4d5   :  { %v2040_v1 = vsel %vm1453_vm3, %v2000_v25, %v2039_v40  ;;  %v1984_v16 = vrot.slane %v1864_v48, %v4250_v28  ;;  %v1885_v6 = vpop.permute.xlu0 %1884  ;;  %v2029_v36 = vsel %vm1459_vm6, %v1948_v61, %v2028_v56 }
 0x4d6   :  { %v2041_v46 = vsel %vm1455_vm4, %v2004_v2, %v2040_v1  ;;  %v2012_v49 = vrot.slane %v1885_v6, %v4250_v28 }
 0x4d7   :  { %v2037_v62 = vsel %vm1461_vm7, %v1984_v16, %v2036_v58  ;;  %v2042_v29 = vsel %vm1457_vm5, %v2008_v23, %v2041_v46 }
 0x4d8   :  { %v1840_v51 = vpop.permute.xlu1 %1839  ;;  %v2055_v43 = vsel %vm1488_vm8, %v2037_v62, 0.0  ;;  %v2043_v21 = vsel %vm1459_vm6, %v2012_v49, %v2042_v29 }
 0x4d9   :  { %v1952_v20 = vrot.slane %v1840_v51, %v4250_v28  ;;  %2056 = vadd.xlane.f32.xlu0 %v2055_v43  ;;  %v1888_v11 = vpop.permute.xlu0 %1887 }
 0x4da   :  { %v2016_v38 = vrot.slane %v1888_v11, %v4250_v28 }
 0x4db   :  { %v2030_v25 = vsel %vm1461_vm7, %v1952_v20, %v2029_v36 }
 0x4dc   :  { %v2052_v39 = vsel %vm1488_vm8, %v2030_v25, 0.0  ;;  %v2044_v3 = vsel %vm1461_vm7, %v2016_v38, %v2043_v21 }
 0x4dd   :  { %2053 = vadd.xlane.f32.xlu0 %v2052_v39  ;;  %v2058_v8 = vsel %vm1488_vm8, %v2044_v3, 0.0 }
 0x4de   :  { %2059 = vadd.xlane.f32.xlu1 %v2058_v8 }
 0x538   :  { %v2051_v2 = vpop.xlane.xlu1 %2050 }
 0x539   :  { %3519 = vrcp.f32 %v2051_v2 }
 0x543   :  { %v3520_v40 = vpop.eup %3519 }
 0x544   :  { %v2072_v48 = vrot.slane %v3520_v40, %v4439_v53  ;;  %v2076_v63 = vrot.slane %v3520_v40, %v4442_v9  ;;  %v2080_v1 = vrot.slane %v3520_v40, %v4445_v19  ;;  %v2084_v61 = vrot.slane %v3520_v40, %v4448_v47 }
 0x545   :  { %v2088_v6 = vrot.slane %v3520_v40, %v4456_v5  ;;  %v2096_v23 = vrot.slane %v3520_v40, %v4466_v31  ;;  %v2100_v62 = vrot.slane %v3520_v40, %v4471_v0 }
 0x546   :  { %v2229_v28 = vmul.f32 %v4475_v24, %v2072_v48  ;;  %v2230_v32 = vmul.f32 %v4477_v42, %v2076_v63  ;;  %v2231_v16 = vmul.f32 %v4483_v41, %v2080_v1  ;;  %v2232_v46 = vmul.f32 %v4487_v34, %v2084_v61  ;;  %v2648_v61 = vld [vmem:[%s4932_s9 + $0x18] sm:$0xff] }
 0x547   :  { %v2233_v58 = vmul.f32 %v4490_v30, %v2088_v6  ;;  %v2092_v24 = vrot.slane %v3520_v40, %v4461_v22  ;;  %v2235_v41 = vmul.f32 %v4510_v55, %v2096_v23  ;;  %v2236_v34 = vmul.f32 %v4519_v59, %v2100_v62  ;;  %v2652_v62 = vld [vmem:[%s4932_s9 + $0x38] sm:$0xff] }
 0x548   :  { %2263 = vperm.xlu0 %3389, %v2229_v28   ;;  %2268 = vperm.xlu1 %3390, %v2230_v32   ;;  %v2646_v28 = vld [vmem:[%s4932_s9 + $0x8] sm:$0xff] }
 0x549   :  { %v2234_v42 = vmul.f32 %v4497_v33, %v2092_v24  ;;  %v2649_v24 = vld [vmem:[%s4932_s9 + $0x20] sm:$0xff] }
 0x54c   :  { %2273 = vperm.xlu1 %3390, %v2231_v16   ;;  %v2647_v16 = vld [vmem:[%s4932_s9 + $0x10] sm:$0xff] }
 0x550   :  { %2278 = vperm.xlu1 %3390, %v2232_v46   ;;  %v3338_v46 = vpack.c.bf16 %v2648_v61, %v2647_v16  ;;  %v5018_v16 = vld [vmem:[#allocation12_spill] sm:$0xff] }
 0x554   :  { %2283 = vperm.xlu1 %3390, %v2233_v58  }
 0x558   :  { %2288 = vperm.xlu1 %3390, %v2234_v42  }
 0x55c   :  { %2293 = vperm.xlu1 %3390, %v2235_v41   ;;  %v2651_v41 = vld [vmem:[%s4932_s9 + $0x30] sm:$0xff] }
 0x560   :  { %2298 = vperm.xlu1 %3390, %v2236_v34   ;;  %v2653_v34 = vld [vmem:[%s4932_s9 + $0x40] sm:$0xff] }
 0x566   :  { %v2057_v27 = vpop.xlane.xlu0 %2056 }
 0x567   :  { %3521 = vrcp.f32 %v2057_v27  ;;  %v2654_v27 = vld [vmem:[%s4932_s9 + $0x48] sm:$0xff] }
 0x56a   :  { %v2054_v49 = vpop.xlane.xlu0 %2053 }
 0x56b   :  { %3523 = vrcp.f32 %v2054_v49  ;;  %v2060_v20 = vpop.xlane.xlu1 %2059  ;;  %v3350_v49 = vpack.c.bf16 %v2654_v27, %v2653_v34  ;;  %v5020_v34 = vld [vmem:[#allocation14_spill] sm:$0xff] }
 0x56c   :  { %3525 = vrcp.f32 %v2060_v20 }
 0x571   :  { %v3522_v30 = vpop.eup %3521 }
 0x572   :  { %v2136_v59 = vrot.slane %v3522_v30, %v4439_v53  ;;  %v2148_v38 = vrot.slane %v3522_v30, %v4448_v47  ;;  %v2152_v39 = vrot.slane %v3522_v30, %v4456_v5  ;;  %v2156_v3 = vrot.slane %v3522_v30, %v4461_v22 }
 0x573   :  { %v2160_v2 = vrot.slane %v3522_v30, %v4466_v31  ;;  %v2144_v1 = vrot.slane %v3522_v30, %v4445_v19 }
 0x574   :  { %v2245_v11 = vmul.f32 %v4563_v14, %v2136_v59 }
 0x575   :  { %v4732_v51 = vpop.eup %3523 }
 0x576   :  { %v2108_v33 = vrot.slane %v4732_v51, %v4442_v9  ;;  %v2104_v43 = vrot.slane %v4732_v51, %v4439_v53  ;;  %v2112_v29 = vrot.slane %v4732_v51, %v4445_v19  ;;  %v2116_v25 = vrot.slane %v4732_v51, %v4448_v47  ;;  %v4763_v48 = vpop.eup %3525 }
 0x577   :  { %v2120_v21 = vrot.slane %v4732_v51, %v4456_v5  ;;  %v2124_v8 = vrot.slane %v4732_v51, %v4461_v22  ;;  %v2128_v40 = vrot.slane %v4732_v51, %v4466_v31  ;;  %v2168_v63 = vrot.slane %v4763_v48, %v4439_v53 }
 0x578   :  { %v2238_v55 = vmul.f32 %v4551_v52, %v2108_v33  ;;  %v2237_v56 = vmul.f32 %v4539_v10, %v2104_v43  ;;  %v2239_v36 = vmul.f32 %v4545_v60, %v2112_v29  ;;  %v2248_v10 = vmul.f32 %v4599_v13, %v2148_v38  ;;  %v2656_v33 = vld [vmem:[%s4932_s9 + $0x58] sm:$0xff]  ;;  %v2658_v29 = vld [vmem:[%s4932_s9 + $0x68] sm:$0xff] }
 0x579   :  { %v2240_v52 = vmul.f32 %v4557_v26, %v2116_v25  ;;  %v2249_v60 = vmul.f32 %v4611_v7, %v2152_v39  ;;  %v2241_v14 = vmul.f32 %v4569_v44, %v2120_v21  ;;  %v2250_v26 = vmul.f32 %v4621_v4, %v2156_v3  ;;  %v2660_v25 = vld [vmem:[%s4932_s9 + $0x78] sm:$0xff] }
 0x57a   :  { %2308 = vperm.xlu1 %3390, %v2238_v55   ;;  %2303 = vperm.xlu0 %3389, %v2237_v56   ;;  %v2242_v13 = vmul.f32 %v4581_v12, %v2124_v8  ;;  %v2251_v44 = vmul.f32 %v4628_v15, %v2160_v2  ;;  %v2243_v7 = vmul.f32 %v4593_v45, %v2128_v40  ;;  %v2645_v12 = vld [vmem:[%s4932_s9] sm:$0xff]  ;;  %v5010_v55 = vld [vmem:[#allocation41_spill] sm:$0xff]  ;;  %v5015_v2 = vld [vmem:[#allocation8_spill] sm:$0xff] }
 0x57b   :  { %v2140_v4 = vrot.slane %v3522_v30, %v4442_v9  ;;  %v3334_v32 = vpack.c.bf16 %v2646_v28, %v2645_v12  ;;  %v2164_v15 = vrot.slane %v3522_v30, %v4471_v0  ;;  %v2253_v45 = vmul.f32 %v4634_v35, %v2168_v63  ;;  %v5009_v30 = vld [vmem:[#allocation40_spill] sm:$0xff]  ;;  %v5014_v8 = vld [vmem:[#allocation9_spill] sm:$0xff] }
 0x57c   :  { %v2247_v35 = vmul.f32 %v4587_v50, %v2144_v1  ;;  %v2172_v58 = vrot.slane %v4763_v48, %v4442_v9  ;;  %v2176_v9 = vrot.slane %v4763_v48, %v4445_v19  ;;  %v2180_v19 = vrot.slane %v4763_v48, %v4448_v47  ;;  %v2655_v47 = vld [vmem:[%s4932_s9 + $0x50] sm:$0xff] }
 0x57d   :  { %3335 = vmatprep.subr.bf16.mxu0 %v3334_v32  ;;  %3368 = vmatprep.subr.bf16.mxu1 %v3334_v32  ;;  %v2246_v53 = vmul.f32 %v4575_v17, %v2140_v4  ;;  %v2252_v6 = vmul.f32 %v4640_v54, %v2164_v15  ;;  %v2132_v17 = vrot.slane %v4732_v51, %v4471_v0  ;;  %v2650_v54 = vld [vmem:[%s4932_s9 + $0x28] sm:$0xff] }
 0x57e   :  { %2343 = vperm.xlu1 %3390, %v2245_v11   ;;  %2313 = vperm.xlu0 %3389, %v2239_v36   ;;  %v3342_v50 = vpack.c.bf16 %v2650_v54, %v2649_v24  ;;  %v2254_v23 = vmul.f32 %v4605_v57, %v2172_v58  ;;  %v2255_v57 = vmul.f32 %v4617_v37, %v2176_v9  ;;  %v5011_v11 = vld [vmem:[#allocation42_spill] sm:$0xff]  ;;  %v5019_v24 = vld [vmem:[#allocation13_spill] sm:$0xff] }
 0x57f   :  { %3337 = vmatpush3.bf16.msra.mxu0 %v3334_v32  ;;  %3376 = vmatpush3.bf16.msra.mxu1 %v3334_v32  ;;  %v2244_v42 = vmul.f32 %v4646_v18, %v2132_v17  ;;  %v3346_v18 = vpack.c.bf16 %v2652_v62, %v2651_v41  ;;  %v2256_v51 = vmul.f32 %v5009_v30, %v2180_v19 }
 0x580   :  { %3339 = vmatprep.subr.bf16.mxu0 %v3338_v46  ;;  %3369 = vmatprep.subr.bf16.mxu1 %v3338_v46  ;;  %v2184_v37 = vrot.slane %v4763_v48, %v4456_v5  ;;  %v3354_v43 = vpack.c.bf16 %v2656_v33, %v2655_v47  ;;  %v2188_v59 = vrot.slane %v4763_v48, %v4461_v22  ;;  %v2657_v5 = vld [vmem:[%s4932_s9 + $0x60] sm:$0xff]  ;;  %v2659_v22 = vld [vmem:[%s4932_s9 + $0x70] sm:$0xff] }
 0x581   :  { %v3358_v20 = vpack.c.bf16 %v2658_v29, %v2657_v5  ;;  %v2192_v38 = vrot.slane %v4763_v48, %v4466_v31  ;;  %v2196_v21 = vrot.slane %v4763_v48, %v4471_v0  ;;  %v5013_v31 = vld [vmem:[#allocation44_spill] sm:$0xff]  ;;  %v5017_v48 = vld [vmem:[#allocation11_spill] sm:$0xff] }
 0x582   :  { %2358 = vperm.xlu1 %3390, %v2248_v10   ;;  %2318 = vperm.xlu0 %3389, %v2240_v52   ;;  %v2257_v56 = vmul.f32 %v5010_v55, %v2184_v37  ;;  %v2258_v36 = vmul.f32 %v5011_v11, %v2188_v59  ;;  %v3362_v10 = vpack.c.bf16 %v2660_v25, %v2659_v22  ;;  %v5012_v52 = vld [vmem:[#allocation43_spill] sm:$0xff] }
 0x583   :  { %3341 = vmatpush3.bf16.msra.mxu0 %v3338_v46  ;;  %3377 = vmatpush3.bf16.msra.mxu1 %v3338_v46  ;;  %v2259_v39 = vmul.f32 %v5012_v52, %v2192_v38  ;;  %v5021_v5 = vld [vmem:[#allocation15_spill] sm:$0xff] }
 0x584   :  { %3343 = vmatprep.subr.bf16.mxu0 %v3342_v50  ;;  %3370 = vmatprep.subr.bf16.mxu1 %v3342_v50 }
 0x586   :  { %2363 = vperm.xlu1 %3390, %v2249_v60   ;;  %2323 = vperm.xlu0 %3389, %v2241_v14   ;;  %v2260_v60 = vmul.f32 %v5013_v31, %v2196_v21 }
 0x587   :  { %3345 = vmatpush3.bf16.msra.mxu0 %v3342_v50  ;;  %3378 = vmatpush3.bf16.msra.mxu1 %v3342_v50 }
 0x588   :  { %3347 = vmatprep.subr.bf16.mxu0 %v3346_v18  ;;  %3371 = vmatprep.subr.bf16.mxu1 %v3346_v18 }
 0x58a   :  { %2368 = vperm.xlu1 %3390, %v2250_v26   ;;  %2328 = vperm.xlu0 %3389, %v2242_v13  }
 0x58b   :  { %3349 = vmatpush3.bf16.msra.mxu0 %v3346_v18  ;;  %3379 = vmatpush3.bf16.msra.mxu1 %v3346_v18 }
 0x58c   :  { %3351 = vmatprep.subr.bf16.mxu0 %v3350_v49  ;;  %3372 = vmatprep.subr.bf16.mxu1 %v3350_v49 }
 0x58e   :  { %2373 = vperm.xlu1 %3390, %v2251_v44   ;;  %2333 = vperm.xlu0 %3389, %v2243_v7   ;;  %v5016_v44 = vld [vmem:[#allocation10_spill] sm:$0xff] }
 0x58f   :  { %3353 = vmatpush3.bf16.msra.mxu0 %v3350_v49  ;;  %3380 = vmatpush3.bf16.msra.mxu1 %v3350_v49 }
 0x590   :  { %3355 = vmatprep.subr.bf16.mxu0 %v3354_v43  ;;  %3373 = vmatprep.subr.bf16.mxu1 %v3354_v43 }
 0x592   :  { %2383 = vperm.xlu1 %3390, %v2253_v45   ;;  %2348 = vperm.xlu0 %3389, %v2246_v53  }
 0x593   :  { %3357 = vmatpush3.bf16.msra.mxu0 %v3354_v43  ;;  %3381 = vmatpush3.bf16.msra.mxu1 %v3354_v43 }
 0x594   :  { %3359 = vmatprep.subr.bf16.mxu0 %v3358_v20  ;;  %3374 = vmatprep.subr.bf16.mxu1 %v3358_v20 }
 0x596   :  { %2378 = vperm.xlu1 %3390, %v2252_v6   ;;  %2353 = vperm.xlu0 %3389, %v2247_v35  }
 0x597   :  { %3361 = vmatpush3.bf16.msra.mxu0 %v3358_v20  ;;  %3382 = vmatpush3.bf16.msra.mxu1 %v3358_v20 }
 0x598   :  { %3363 = vmatprep.subr.bf16.mxu0 %v3362_v10  ;;  %3375 = vmatprep.subr.bf16.mxu1 %v3362_v10 }
 0x59a   :  { %2338 = vperm.xlu1 %3390, %v2244_v42   ;;  %2388 = vperm.xlu0 %3389, %v2254_v23  }
 0x59b   :  { %3365 = vmatpush3.bf16.msra.mxu0 %v3362_v10  ;;  %3383 = vmatpush3.bf16.msra.mxu1 %v3362_v10 }
 0x59e   :  { %2393 = vperm.xlu0 %3389, %v2255_v57  }
 0x5a2   :  { %2398 = vperm.xlu0 %3389, %v2256_v51  }
 0x5a6   :  { %2403 = vperm.xlu0 %3389, %v2257_v56  }
 0x5aa   :  { %2408 = vperm.xlu0 %3389, %v2258_v36  }
 0x5ae   :  { %2413 = vperm.xlu0 %3389, %v2259_v39  }
 0x5b2   :  { %2418 = vperm.xlu0 %3389, %v2260_v60  }
 0x5c7   :  { %v2269_v14 = vpop.permute.xlu1 %2268  ;;  %v2264_v3 = vpop.permute.xlu0 %2263 }
 0x5c8   :  { %v2422_v26 = vmul.f32 %v2269_v14, %v5014_v8  ;;  %v2421_v40 = vmul.f32 %v2264_v3, %v5015_v2 }
 0x5ca   :  { %v2459_v63 = vrot.slane %v2422_v26, 4  ;;  %v2453_v0 = vrot.slane %v2421_v40, 4 }
 0x5cb   :  { %v2274_v13 = vpop.permute.xlu1 %2273 }
 0x5cc   :  { %v2423_v7 = vmul.f32 %v2274_v13, %v5016_v44  ;;  %v2460_v15 = vadd.f32 %v2459_v63, %v2422_v26  ;;  %v2454_v53 = vadd.f32 %v2453_v0, %v2421_v40 }
 0x5ce   :  { %v2465_v28 = vrot.slane %v2423_v7, 4  ;;  %v2461_v6 = vrot.slane %v2460_v15, 2  ;;  %v2455_v58 = vrot.slane %v2454_v53, 2 }
 0x5cf   :  { %v2279_v4 = vpop.permute.xlu1 %2278 }
 0x5d0   :  { %v2424_v12 = vmul.f32 %v2279_v4, %v5017_v48  ;;  %v2466_v1 = vadd.f32 %v2465_v28, %v2423_v7  ;;  %v2462_v41 = vadd.f32 %v2461_v6, %v2460_v15  ;;  %v2456_v57 = vadd.f32 %v2455_v58, %v2454_v53 }
 0x5d2   :  { %v2471_v32 = vrot.slane %v2424_v12, 4  ;;  %v2467_v50 = vrot.slane %v2466_v1, 2  ;;  %v2463_v47 = vrot.slane %v2462_v41, 1  ;;  %v2457_v55 = vrot.slane %v2456_v57, 1 }
 0x5d3   :  { %v2284_v45 = vpop.permute.xlu1 %2283 }
 0x5d4   :  { %v2425_v61 = vmul.f32 %v2284_v45, %v5018_v16  ;;  %v2472_v46 = vadd.f32 %v2471_v32, %v2424_v12  ;;  %v2468_v49 = vadd.f32 %v2467_v50, %v2466_v1  ;;  %v2464_v22 = vadd.f32 %v2463_v47, %v2462_v41  ;;  %v5022_v45 = vld [vmem:[#allocation17_spill] sm:$0xff]  ;;  %v5023_v1 = vld [vmem:[#allocation16_spill] sm:$0xff] }
 0x5d5   :  { %v2458_v10 = vadd.f32 %v2457_v55, %v2456_v57  ;;  %v5028_v55 = vld [vmem:[#allocation20_spill] sm:$0xff] }
 0x5d6   :  { %v2477_v35 = vrot.slane %v2425_v61, 4  ;;  %v2473_v23 = vrot.slane %v2472_v46, 2  ;;  %v2469_v20 = vrot.slane %v2468_v49, 1 }
 0x5d7   :  { %v2289_v17 = vpop.permute.xlu1 %2288  ;;  %v2700_v26 = vsel %vm1449_vm1, %v2464_v22, %v2458_v10  ;;  %v5029_v22 = vld [vmem:[#allocation21_spill] sm:$0xff] }
 0x5d8   :  { %v2426_v54 = vmul.f32 %v2289_v17, %v5019_v24  ;;  %v2478_v42 = vadd.f32 %v2477_v35, %v2425_v61  ;;  %v2474_v30 = vadd.f32 %v2473_v23, %v2472_v46  ;;  %v2470_v31 = vadd.f32 %v2469_v20, %v2468_v49  ;;  %v5024_v17 = vld [vmem:[#allocation24_spill] sm:$0xff]  ;;  %v5025_v24 = vld [vmem:[#allocation18_spill] sm:$0xff] }
 0x5da   :  { %v2483_v9 = vrot.slane %v2426_v54, 4  ;;  %v2479_v62 = vrot.slane %v2478_v42, 2  ;;  %v2475_v11 = vrot.slane %v2474_v30, 1  ;;  %v2701_v40 = vsel %vm1451_vm2, %v2470_v31, %v2700_v26 }
 0x5db   :  { %v2294_v18 = vpop.permute.xlu1 %2293 }
 0x5dc   :  { %v2484_v19 = vadd.f32 %v2483_v9, %v2426_v54  ;;  %v2427_v27 = vmul.f32 %v2294_v18, %v5020_v34  ;;  %v2480_v33 = vadd.f32 %v2479_v62, %v2478_v42  ;;  %v2476_v60 = vadd.f32 %v2475_v11, %v2474_v30  ;;  %v5026_v18 = vld [vmem:[#allocation27_spill] sm:$0xff] }
 0x5de   :  { %v2485_v51 = vrot.slane %v2484_v19, 2  ;;  %v2489_v37 = vrot.slane %v2427_v27, 4  ;;  %v2481_v25 = vrot.slane %v2480_v33, 1  ;;  %v2702_v63 = vsel %vm1453_vm3, %v2476_v60, %v2701_v40  ;;  %v5031_v40 = vld [vmem:[#allocation29_spill] sm:$0xff] }
 0x5df   :  { %v2299_v43 = vpop.permute.xlu1 %2298 }
 0x5e0   :  { %v2486_v56 = vadd.f32 %v2485_v51, %v2484_v19  ;;  %v2490_v59 = vadd.f32 %v2489_v37, %v2427_v27  ;;  %v2428_v29 = vmul.f32 %v2299_v43, %v5021_v5  ;;  %v2482_v8 = vadd.f32 %v2481_v25, %v2480_v33  ;;  %v5027_v19 = vld [vmem:[#allocation19_spill] sm:$0xff] }
 0x5e2   :  { %v2491_v36 = vrot.slane %v2490_v59, 2  ;;  %v2495_v38 = vrot.slane %v2428_v29, 4  ;;  %v2487_v52 = vrot.slane %v2486_v56, 1  ;;  %v2703_v4 = vsel %vm1455_vm4, %v2482_v8, %v2702_v63 }
 0x5e4   :  { %v2492_v39 = vadd.f32 %v2491_v36, %v2490_v59  ;;  %v2496_v21 = vadd.f32 %v2495_v38, %v2428_v29  ;;  %v2488_v13 = vadd.f32 %v2487_v52, %v2486_v56  ;;  %v5030_v52 = vld [vmem:[#allocation28_spill] sm:$0xff] }
 0x5e6   :  { %v2493_v14 = vrot.slane %v2492_v39, 1  ;;  %v2497_v3 = vrot.slane %v2496_v21, 2  ;;  %v2704_v48 = vsel %vm1457_vm5, %v2488_v13, %v2703_v4 }
 0x5e8   :  { %v2498_v2 = vadd.f32 %v2497_v3, %v2496_v21  ;;  %v2494_v44 = vadd.f32 %v2493_v14, %v2492_v39 }
 0x5ea   :  { %v2499_v7 = vrot.slane %v2498_v2, 1  ;;  %v2705_v12 = vsel %vm1459_vm6, %v2494_v44, %v2704_v48 }
 0x5ec   :  { %v2500_v0 = vadd.f32 %v2499_v7, %v2498_v2  ;;  %v5032_v7 = vld [vmem:[#allocation22_spill] sm:$0xff] }
 0x5ee   :  { %v2706_v28 = vsel %vm1461_vm7, %v2500_v0, %v2705_v12 }
 0x5ef   :  { %3260 = vmatprep.mubr.f32.mxu0 %v2706_v28 }
 0x5f9   :  { %v2309_v32 = vpop.permute.xlu1 %2308  ;;  %v2304_v15 = vpop.permute.xlu0 %2303 }
 0x5fa   :  { %v2430_v53 = vmul.f32 %v2309_v32, %v5022_v45  ;;  %v2429_v16 = vmul.f32 %v2304_v15, %v5023_v1  ;;  %v5033_v45 = vld [vmem:[#allocation30_spill] sm:$0xff] }
 0x5fc   :  { %v2507_v61 = vrot.slane %v2430_v53, 4  ;;  %v2501_v46 = vrot.slane %v2429_v16, 4 }
 0x5fd   :  { %v2344_v6 = vpop.permute.xlu1 %2343  ;;  %v2314_v35 = vpop.permute.xlu0 %2313 }
 0x5fe   :  { %v2437_v58 = vmul.f32 %v2344_v6, %v5024_v17  ;;  %v2431_v54 = vmul.f32 %v2314_v35, %v5025_v24  ;;  %v2508_v50 = vadd.f32 %v2507_v61, %v2430_v53  ;;  %v2502_v42 = vadd.f32 %v2501_v46, %v2429_v16 }
 0x600   :  { %v2549_v23 = vrot.slane %v2437_v58, 4  ;;  %v2513_v62 = vrot.slane %v2431_v54, 4  ;;  %v2509_v27 = vrot.slane %v2508_v50, 2  ;;  %v2503_v49 = vrot.slane %v2502_v42, 2 }
 0x601   :  { %v2359_v9 = vpop.permute.xlu1 %2358  ;;  %v2319_v41 = vpop.permute.xlu0 %2318 }
 0x602   :  { %v2440_v57 = vmul.f32 %v2359_v9, %v5026_v18  ;;  %v2432_v34 = vmul.f32 %v2319_v41, %v5027_v19  ;;  %v2550_v30 = vadd.f32 %v2549_v23, %v2437_v58  ;;  %v2514_v47 = vadd.f32 %v2513_v62, %v2431_v54  ;;  %v5034_v58 = vld [vmem:[#allocation25_spill] sm:$0xff] }
 0x603   :  { %v2510_v59 = vadd.f32 %v2509_v27, %v2508_v50  ;;  %v2504_v5 = vadd.f32 %v2503_v49, %v2502_v42 }
 0x604   :  { %v2519_v33 = vrot.slane %v2432_v34, 4  ;;  %v2567_v43 = vrot.slane %v2440_v57, 4  ;;  %v2551_v29 = vrot.slane %v2550_v30, 2  ;;  %v2515_v36 = vrot.slane %v2514_v47, 2 }
 0x605   :  { %v2364_v51 = vpop.permute.xlu1 %2363  ;;  %v2324_v37 = vpop.permute.xlu0 %2323  ;;  %v2511_v60 = vrot.slane %v2510_v59, 1  ;;  %v2505_v14 = vrot.slane %v2504_v5, 1 }
 0x606   :  { %v2433_v56 = vmul.f32 %v2324_v37, %v5028_v55  ;;  %v2520_v38 = vadd.f32 %v2519_v33, %v2432_v34  ;;  %v2568_v10 = vadd.f32 %v2567_v43, %v2440_v57  ;;  %v2441_v39 = vmul.f32 %v2364_v51, %v5030_v52  ;;  %v5035_v37 = vld [vmem:[#allocation31_spill] sm:$0xff]  ;;  %v5036_v33 = vld [vmem:[#allocation26_spill] sm:$0xff] }
 0x607   :  { %v2552_v3 = vadd.f32 %v2551_v29, %v2550_v30  ;;  %v2516_v13 = vadd.f32 %v2515_v36, %v2514_v47  ;;  %v2512_v32 = vadd.f32 %v2511_v60, %v2510_v59  ;;  %v2506_v15 = vadd.f32 %v2505_v14, %v2504_v5 }
 0x608   :  { %v2525_v21 = vrot.slane %v2433_v56, 4  ;;  %v2521_v2 = vrot.slane %v2520_v38, 2  ;;  %v2569_v4 = vrot.slane %v2568_v10, 2  ;;  %v2573_v0 = vrot.slane %v2441_v39, 4 }
 0x609   :  { %v2369_v20 = vpop.permute.xlu1 %2368  ;;  %v2329_v11 = vpop.permute.xlu0 %2328  ;;  %v2553_v61 = vrot.slane %v2552_v3, 1  ;;  %v2517_v46 = vrot.slane %v2516_v13, 1  ;;  %v2707_v9 = vsel %vm1449_vm1, %v2512_v32, %v2506_v15 }
 0x60a   :  { %v2434_v25 = vmul.f32 %v2329_v11, %v5029_v22  ;;  %v2442_v44 = vmul.f32 %v2369_v20, %v5031_v40  ;;  %v2526_v48 = vadd.f32 %v2525_v21, %v2433_v56  ;;  %v2522_v6 = vadd.f32 %v2521_v2, %v2520_v38 }
 0x60b   :  { %v2570_v54 = vadd.f32 %v2569_v4, %v2568_v10  ;;  %v2574_v50 = vadd.f32 %v2573_v0, %v2441_v39  ;;  %v2554_v19 = vadd.f32 %v2553_v61, %v2552_v3  ;;  %v2518_v34 = vadd.f32 %v2517_v46, %v2516_v13  ;;  %v5037_v39 = vld [vmem:[#allocation23_spill] sm:$0xff] }
 0x60c   :  { %v2531_v31 = vrot.slane %v2434_v25, 4  ;;  %v2579_v35 = vrot.slane %v2442_v44, 4  ;;  %v2527_v42 = vrot.slane %v2526_v48, 2  ;;  %v2523_v27 = vrot.slane %v2522_v6, 1 }
 0x60d   :  { %v2374_v8 = vpop.permute.xlu1 %2373  ;;  %v2334_v26 = vpop.permute.xlu0 %2333  ;;  %v2571_v55 = vrot.slane %v2570_v54, 1  ;;  %v2575_v56 = vrot.slane %v2574_v50, 2 }
 0x60e   :  { %v2435_v63 = vmul.f32 %v2334_v26, %v5032_v7  ;;  %v2532_v12 = vadd.f32 %v2531_v31, %v2434_v25  ;;  %v2443_v53 = vmul.f32 %v2374_v8, %v5033_v45  ;;  %v2580_v49 = vadd.f32 %v2579_v35, %v2442_v44 }
 0x60f   :  { %v2528_v59 = vadd.f32 %v2527_v42, %v2526_v48  ;;  %v2708_v25 = vsel %vm1451_vm2, %v2518_v34, %v2707_v9  ;;  %v2524_v10 = vadd.f32 %v2523_v27, %v2522_v6  ;;  %v2572_v8 = vadd.f32 %v2571_v55, %v2570_v54  ;;  %v5040_v6 = vld [vmem:[#allocation32_spill] sm:$0xff] }
 0x610   :  { %v2537_v28 = vrot.slane %v2435_v63, 4  ;;  %v2533_v23 = vrot.slane %v2532_v12, 2  ;;  %v2585_v41 = vrot.slane %v2443_v53, 4  ;;  %v2581_v52 = vrot.slane %v2580_v49, 2 }
 0x611   :  { %v2384_v1 = vpop.permute.xlu1 %2383  ;;  %v2349_v16 = vpop.permute.xlu0 %2348  ;;  %v2576_v26 = vadd.f32 %v2575_v56, %v2574_v50  ;;  %v2529_v13 = vrot.slane %v2528_v59, 1  ;;  %v2709_v0 = vsel %vm1453_vm3, %v2524_v10, %v2708_v25 }
 0x612   :  { %v2538_v17 = vadd.f32 %v2537_v28, %v2435_v63  ;;  %v2438_v24 = vmul.f32 %v2349_v16, %v5034_v58  ;;  %v2534_v5 = vadd.f32 %v2533_v23, %v2532_v12  ;;  %v2586_v29 = vadd.f32 %v2585_v41, %v2443_v53  ;;  %v5038_v28 = vld [vmem:[#allocation33_spill] sm:$0xff]  ;;  %v5039_v16 = vld [vmem:[#allocation35_spill] sm:$0xff] }
 0x613   :  { %v2582_v15 = vadd.f32 %v2581_v52, %v2580_v49  ;;  %v2577_v46 = vrot.slane %v2576_v26, 1  ;;  %v2445_v35 = vmul.f32 %v2384_v1, %v5040_v6 }
 0x614   :  { %v2555_v62 = vrot.slane %v2438_v24, 4  ;;  %v2539_v30 = vrot.slane %v2538_v17, 2  ;;  %v2535_v40 = vrot.slane %v2534_v5, 1  ;;  %v2587_v44 = vrot.slane %v2586_v29, 2 }
 0x615   :  { %v2379_v18 = vpop.permute.xlu1 %2378  ;;  %v2354_v57 = vpop.permute.xlu0 %2353  ;;  %v2583_v34 = vrot.slane %v2582_v15, 1 }
 0x616   :  { %v2556_v51 = vadd.f32 %v2555_v62, %v2438_v24  ;;  %v2444_v47 = vmul.f32 %v2379_v18, %v5035_v37  ;;  %v2439_v43 = vmul.f32 %v2354_v57, %v5036_v33  ;;  %v2540_v31 = vadd.f32 %v2539_v30, %v2538_v17  ;;  %v5041_v18 = vld [vmem:[#allocation34_spill] sm:$0xff] }
 0x617   :  { %v2530_v24 = vadd.f32 %v2529_v13, %v2528_v59  ;;  %v2536_v54 = vadd.f32 %v2535_v40, %v2534_v5  ;;  %v2588_v50 = vadd.f32 %v2587_v44, %v2586_v29  ;;  %v2578_v33 = vadd.f32 %v2577_v46, %v2576_v26  ;;  %v5043_v13 = vld [vmem:[#allocation36_spill] sm:$0xff] }
 0x618   :  { %v2557_v20 = vrot.slane %v2556_v51, 2  ;;  %v2591_v11 = vrot.slane %v2444_v47, 4  ;;  %v2561_v36 = vrot.slane %v2439_v43, 4  ;;  %v2541_v45 = vrot.slane %v2540_v31, 1 }
 0x619   :  { %v2339_v38 = vpop.permute.xlu1 %2338  ;;  %v2389_v22 = vpop.permute.xlu0 %2388  ;;  %v2589_v55 = vrot.slane %v2588_v50, 1  ;;  %v2584_v10 = vadd.f32 %v2583_v34, %v2582_v15 }
 0x61a   :  { %v2436_v21 = vmul.f32 %v2339_v38, %v5037_v39  ;;  %v2558_v60 = vadd.f32 %v2557_v20, %v2556_v51  ;;  %v2592_v14 = vadd.f32 %v2591_v11, %v2444_v47  ;;  %v2562_v3 = vadd.f32 %v2561_v36, %v2439_v43  ;;  %v5042_v38 = vld [vmem:[#allocation37_spill] sm:$0xff] }
 0x61b   :  { %v2446_v32 = vmul.f32 %v2389_v22, %v5038_v28  ;;  %v2542_v27 = vadd.f32 %v2541_v45, %v2540_v31  ;;  %v2597_v51 = vrot.slane %v2445_v35, 4  ;;  %v2710_v43 = vsel %vm1455_vm4, %v2530_v24, %v2709_v0 }
 0x61c   :  { %v2543_v2 = vrot.slane %v2436_v21, 4  ;;  %v2559_v7 = vrot.slane %v2558_v60, 1  ;;  %v2563_v63 = vrot.slane %v2562_v3, 2  ;;  %v2593_v48 = vrot.slane %v2592_v14, 2 }
 0x61d   :  { %v2394_v4 = vpop.permute.xlu0 %2393  ;;  %v2603_v62 = vrot.slane %v2446_v32, 4  ;;  %v2711_v11 = vsel %vm1457_vm5, %v2536_v54, %v2710_v43  ;;  %v2598_v52 = vadd.f32 %v2597_v51, %v2445_v35  ;;  %v2590_v31 = vadd.f32 %v2589_v55, %v2588_v50 }
 0x61e   :  { %v2544_v12 = vadd.f32 %v2543_v2, %v2436_v21  ;;  %v2564_v53 = vadd.f32 %v2563_v63, %v2562_v3  ;;  %v2447_v61 = vmul.f32 %v2394_v4, %v5039_v16  ;;  %v2560_v17 = vadd.f32 %v2559_v7, %v2558_v60 }
 0x61f   :  { %v2594_v9 = vadd.f32 %v2593_v48, %v2592_v14  ;;  %v2604_v20 = vadd.f32 %v2603_v62, %v2446_v32  ;;  %v2712_v25 = vsel %vm1459_vm6, %v2542_v27, %v2711_v11  ;;  %v2599_v4 = vrot.slane %v2598_v52, 2 }
 0x620   :  { %v2545_v58 = vrot.slane %v2544_v12, 2  ;;  %v2565_v42 = vrot.slane %v2564_v53, 1  ;;  %v2609_v30 = vrot.slane %v2447_v61, 4  ;;  %v2714_v37 = vsel %vm1449_vm1, %v2560_v17, %v2554_v19 }
 0x621   :  { %v2399_v23 = vpop.permute.xlu0 %2398  ;;  %v2595_v5 = vrot.slane %v2594_v9, 1  ;;  %v2605_v26 = vrot.slane %v2604_v20, 2  ;;  %v2600_v46 = vadd.f32 %v2599_v4, %v2598_v52 }
 0x622   :  { %v2546_v41 = vadd.f32 %v2545_v58, %v2544_v12  ;;  %v2448_v57 = vmul.f32 %v2399_v23, %v5041_v18  ;;  %v2566_v49 = vadd.f32 %v2565_v42, %v2564_v53  ;;  %v2610_v36 = vadd.f32 %v2609_v30, %v2447_v61  ;;  %v5044_v53 = vld [vmem:[#allocation39_spill] sm:$0xff]  ;;  %v5045_v23 = vld [vmem:[#allocation38_spill] sm:$0xff] }
 0x623   :  { %v2596_v40 = vadd.f32 %v2595_v5, %v2594_v9  ;;  %v2606_v15 = vadd.f32 %v2605_v26, %v2604_v20  ;;  %v2601_v62 = vrot.slane %v2600_v46, 1 }
 0x624   :  { %v2547_v1 = vrot.slane %v2546_v41, 1  ;;  %v2615_v47 = vrot.slane %v2448_v57, 4  ;;  %v2715_v56 = vsel %vm1451_vm2, %v2566_v49, %v2714_v37  ;;  %v2611_v7 = vrot.slane %v2610_v36, 2 }
 0x625   :  { %v2404_v59 = vpop.permute.xlu0 %2403  ;;  %v2716_v19 = vsel %vm1453_vm3, %v2572_v8, %v2715_v56  ;;  %v2607_v54 = vrot.slane %v2606_v15, 1 }
 0x626   :  { %v2548_v29 = vadd.f32 %v2547_v1, %v2546_v41  ;;  %v2449_v22 = vmul.f32 %v2404_v59, %v5042_v38  ;;  %v2616_v39 = vadd.f32 %v2615_v47, %v2448_v57  ;;  %v2717_v3 = vsel %vm1455_vm4, %v2578_v33, %v2716_v19 }
 0x627   :  { %v2718_v44 = vsel %vm1457_vm5, %v2584_v10, %v2717_v3  ;;  %v2612_v61 = vadd.f32 %v2611_v7, %v2610_v36  ;;  %v2608_v49 = vadd.f32 %v2607_v54, %v2606_v15  ;;  %v2602_v47 = vadd.f32 %v2601_v62, %v2600_v46 }
 0x628   :  { %v2713_v21 = vsel %vm1461_vm7, %v2548_v29, %v2712_v25  ;;  %v2621_v60 = vrot.slane %v2449_v22, 4  ;;  %v2719_v8 = vsel %vm1459_vm6, %v2590_v31, %v2718_v44  ;;  %v2617_v0 = vrot.slane %v2616_v39, 2 }
 0x629   :  { %3261 = vmatmul.mubr.f32.vlgmr.msra.gmra.mrb[48].mxu0 %v2713_v21  ;;  %v2409_v14 = vpop.permute.xlu0 %2408  ;;  %v2720_v12 = vsel %vm1461_vm7, %v2596_v40, %v2719_v8  ;;  %v2613_v41 = vrot.slane %v2612_v61, 1  ;;  %v2721_v59 = vsel %vm1449_vm1, %v2608_v49, %v2602_v47 }
 0x62a   :  { %v2450_v2 = vmul.f32 %v2409_v14, %v5043_v13  ;;  %v2622_v63 = vadd.f32 %v2621_v60, %v2449_v22  ;;  %3263 = vmatprep.mubr.f32.mxu1 %v2720_v12  ;;  %v2618_v6 = vadd.f32 %v2617_v0, %v2616_v39  ;;  %v2865_v39 = vld [vmem:[%s4933_s10] ss:$0 sm:$0xff] }
 0x62b   :  { %v2614_v1 = vadd.f32 %v2613_v41, %v2612_v61 }
 0x62c   :  { %v2627_v48 = vrot.slane %v2450_v2, 4  ;;  %v2623_v28 = vrot.slane %v2622_v63, 2  ;;  %v2619_v18 = vrot.slane %v2618_v6, 1 }
 0x62d   :  { %v2414_v32 = vpop.permute.xlu0 %2413  ;;  %v2722_v20 = vsel %vm1451_vm2, %v2614_v1, %v2721_v59 }
 0x62e   :  { %v2628_v45 = vadd.f32 %v2627_v48, %v2450_v2  ;;  %v2451_v16 = vmul.f32 %v2414_v32, %v5044_v53  ;;  %v2624_v58 = vadd.f32 %v2623_v28, %v2622_v63  ;;  %v2620_v33 = vadd.f32 %v2619_v18, %v2618_v6 }
 0x630   :  { %v2629_v35 = vrot.slane %v2628_v45, 2  ;;  %v2633_v17 = vrot.slane %v2451_v16, 4  ;;  %v2625_v27 = vrot.slane %v2624_v58, 1  ;;  %v2723_v36 = vsel %vm1453_vm3, %v2620_v33, %v2722_v20 }
 0x631   :  { %v2419_v24 = vpop.permute.xlu0 %2418 }
 0x632   :  { %v2630_v50 = vadd.f32 %v2629_v35, %v2628_v45  ;;  %v2634_v42 = vadd.f32 %v2633_v17, %v2451_v16  ;;  %v2452_v9 = vmul.f32 %v2419_v24, %v5045_v23  ;;  %v2626_v56 = vadd.f32 %v2625_v27, %v2624_v58 }
 0x634   :  { %v2635_v57 = vrot.slane %v2634_v42, 2  ;;  %v2639_v34 = vrot.slane %v2452_v9, 4  ;;  %v2631_v30 = vrot.slane %v2630_v50, 1  ;;  %v2724_v22 = vsel %vm1455_vm4, %v2626_v56, %v2723_v36 }
 0x636   :  { %v2636_v51 = vadd.f32 %v2635_v57, %v2634_v42  ;;  %v2640_v37 = vadd.f32 %v2639_v34, %v2452_v9  ;;  %v2632_v5 = vadd.f32 %v2631_v30, %v2630_v50 }
 0x638   :  { %v2637_v43 = vrot.slane %v2636_v51, 1  ;;  %v2641_v55 = vrot.slane %v2640_v37, 2  ;;  %v2725_v19 = vsel %vm1457_vm5, %v2632_v5, %v2724_v22 }
 0x63a   :  { %v2642_v29 = vadd.f32 %v2641_v55, %v2640_v37  ;;  %v2638_v11 = vadd.f32 %v2637_v43, %v2636_v51 }
 0x63c   :  { %v2643_v38 = vrot.slane %v2642_v29, 1  ;;  %v2726_v10 = vsel %vm1459_vm6, %v2638_v11, %v2725_v19 }
 0x63e   :  { %v2644_v25 = vadd.f32 %v2643_v38, %v2642_v29 }
 0x640   :  { %v2727_v52 = vsel %vm1461_vm7, %v2644_v25, %v2726_v10 }
 0x641   :  { %3264 = vmatmul.mubr.f32.vlgmr.msra.gmra.mrb[48].mxu1 %v2727_v52 }
 0x6fc   :  { %v3262_v21 = vpop.f32.mrb[48].mxu0 }
 0x6fd   :  { %v2804_v31 = vadd.f32 %v3262_v21, %v2865_v39  ;;  %v2798_v60 = vpop.f32.mrb[49].mxu0 }
 0x6fe   :  { %v2799_v14 = vadd.f32 %v2865_v39, %v2798_v60 }
 0x6ff   :  { %2818 = vst [vmem:[%s4934_s11 + $0x8] sm:$0xff] %v2804_v31 }
 0x700   :  { %2817 = vst [vmem:[%s4934_s11] sm:$0xff] %v2799_v14 }
 0x714   :  { %v3265_v3 = vpop.f32.mrb[48].mxu1 }
 0x715   :  { %v2814_v26 = vadd.f32 %v3265_v3, %v2865_v39  ;;  %v2808_v13 = vpop.f32.mrb[49].mxu1 }
 0x716   :  { %v2809_v2 = vadd.f32 %v2865_v39, %v2808_v13 }
 0x717   :  { %2820 = vst [vmem:[%s4934_s11 + $0x18] sm:$0xff] %v2814_v26 }
 0x718   :  { %2819 = vst [vmem:[%s4934_s11 + $0x10] sm:$0xff] %v2809_v2 }
 0x719   :  { %2825 = vsyncpa [#allocation3], 1 }
 0x71a   :  { %2826 = vsyncpa [#allocation4], 1 }

</bundles_post_ra>
